<compile_context>
chip_gen: v5e
topology: v5e:2x2
jax: 0.10.0
libtpu: 0.0.40
codegen_flags: <defaults>
</compile_context>

<pallas_src>
import functools

import jax
import jax.numpy as jnp
from jax.experimental import pallas as pl
from jax.experimental.pallas import tpu as pltpu

_EPS = 1e-5          # nn.InstanceNorm2d default
_LRELU_SLOPE = 0.01  # nn.LeakyReLU default


# ----------------------------------------------------------------------------
# Pallas kernels
# ----------------------------------------------------------------------------
def _upsample_kernel(x_ref, w_ref, b_ref, o_ref):
    """ConvTranspose2d(k=2,s=2) taps: (4*Cup, Cin) @ (Cin, H*W) + bias."""
    o_ref[0] = (
        jnp.dot(w_ref[...], x_ref[0], preferred_element_type=jnp.float32)
        + b_ref[...]
    )                                              # (4*Cup, H*W)


def _fused_conv_kernel(u_ref, w1_ref, b1_ref, w2_ref, b2_ref, fcm_ref, fcv_ref,
                       mask_ref, o_ref, zpad_ref, *, wp, lext, inv_count):
    """conv1(3x3)+IN+ReLU -> conv2(3x3)+IN+AdaIN+LeakyReLU for one batch item.

    Spatial layout: flattened row-padded image of row width `wp = W2+2`.
    A 3x3 conv becomes 9 matmuls against contiguous slices at offsets
    ky*wp + kx; garbage columns (x >= W2) are masked out of the statistics.
    """
    u = u_ref[0]                                   # (Cup, Lbuf)
    mask = mask_ref[...]                           # (1, Lext)

    def conv9(src, w_taps_ref, bias):
        cout = w_taps_ref.shape[1]
        acc = jnp.zeros((cout, lext), jnp.float32)
        for ky in range(3):
            for kx in range(3):
                off = ky * wp + kx
                acc = acc + jnp.dot(w_taps_ref[ky * 3 + kx],
                                    src[:, off:off + lext],
                                    preferred_element_type=jnp.float32)
        return acc + bias                          # (Cout, Lext)

    def inorm_masked(acc):
        mean = jnp.sum(acc * mask, axis=1, keepdims=True) * inv_count
        diff = (acc - mean) * mask
        var = jnp.sum(diff * diff, axis=1, keepdims=True) * inv_count
        return diff * jax.lax.rsqrt(var + _EPS)    # garbage columns stay 0

    # --- conv1 + InstanceNorm + ReLU -----------------------------------------
    z = jnp.maximum(inorm_masked(conv9(u, w1_ref, b1_ref[...])), 0.0)

    # re-embed conv1 output into a zero-padded flat buffer (VMEM scratch);
    # the shift by wp+1 places (y, x) at padded position (y+1, x+1) and the
    # masked garbage columns land exactly on the zero padding ring.
    zpad_ref[...] = jnp.zeros_like(zpad_ref)
    zpad_ref[:, wp + 1: wp + 1 + lext] = z
    zp = zpad_ref[...]

    # --- conv2 + InstanceNorm + AdaIN + LeakyReLU -----------------------------
    xn = inorm_masked(conv9(zp, w2_ref, b2_ref[...]))
    y = fcv_ref[0] * xn + fcm_ref[0]               # (Cout,1) broadcast over lanes
    o_ref[0] = jnp.where(y > 0, y, _LRELU_SLOPE * y)


# ----------------------------------------------------------------------------
# Wrapper (layout plumbing only; all math is in the Pallas kernels / one small
# hoisted FC matmul)
# ----------------------------------------------------------------------------
@jax.jit
def up_conv_forward(x_nchw, shared_code, p):
    n, cin, h, w = x_nchw.shape
    cp = pltpu.CompilerParams(dimension_semantics=("parallel",))

    # --- ConvTranspose2d(in_ch, in_ch, k=2, s=2) ------------------------------
    up_w = p["up_w"]                               # (Cin, Cup, 2, 2) torch layout
    cup = up_w.shape[1]
    hw = h * w
    w4 = jnp.transpose(up_w, (2, 3, 1, 0)).reshape(4 * cup, cin)  # rows (kh,kw,co)
    b4 = jnp.tile(p["up_b"], 4)[:, None]                           # (4*Cup, 1)
    x3 = x_nchw.reshape(n, cin, hw).astype(jnp.float32)

    y4 = pl.pallas_call(
        _upsample_kernel,
        out_shape=jax.ShapeDtypeStruct((n, 4 * cup, hw), jnp.float32),
        grid=(n,),
        in_specs=[
            pl.BlockSpec((1, cin, hw), lambda i: (i, 0, 0)),
            pl.BlockSpec((4 * cup, cin), lambda i: (0, 0)),
            pl.BlockSpec((4 * cup, 1), lambda i: (0, 0)),
        ],
        out_specs=pl.BlockSpec((1, 4 * cup, hw), lambda i: (i, 0, 0)),
        compiler_params=cp,
    )(x3, w4, b4)

    # sub-pixel interleave + zero-pad + flatten (tiny, pure layout plumbing)
    h2, w2 = 2 * h, 2 * w
    wp = w2 + 2                                    # padded row width
    lext = h2 * wp                                 # extended flattened length
    lbuf = (h2 + 3) * wp                           # padded flat buffer length
    u = (y4.reshape(n, 2, 2, cup, h, w)
           .transpose(0, 3, 4, 1, 5, 2)            # (n, co, h, kh, w, kw)
           .reshape(n, cup, h2, w2))
    u_flat = jnp.pad(u, ((0, 0), (0, 0), (1, 2), (1, 1))).reshape(n, cup, lbuf)

    # --- weights / hoisted AdaIN rows / valid-column mask ---------------------
    cout = p["c1_w"].shape[0]
    w1t = jnp.transpose(p["c1_w"], (2, 3, 0, 1)).reshape(9, cout, cup)   # (tap,co,ci)
    w2t = jnp.transpose(p["c2_w"], (2, 3, 0, 1)).reshape(9, cout, cout)
    b1 = p["c1_b"][:, None]
    b2 = p["c2_b"][:, None]

    sc = shared_code.astype(jnp.float32)
    fcm = (jnp.dot(sc, p["fc_mean_w"].T) + p["fc_mean_b"])[:, :, None]    # (N,Cout,1)
    fcv = jnp.maximum(jnp.dot(sc, p["fc_var_w"].T) + p["fc_var_b"],
                      0.0)[:, :, None]                                    # (N,Cout,1)

    mask = ((jnp.arange(lext) % wp) < w2).astype(jnp.float32)[None, :]    # (1, Lext)

    kernel = functools.partial(_fused_conv_kernel, wp=wp, lext=lext,
                               inv_count=1.0 / (h2 * w2))
    out_ext = pl.pallas_call(
        kernel,
        out_shape=jax.ShapeDtypeStruct((n, cout, lext), jnp.float32),
        grid=(n,),
        in_specs=[
            pl.BlockSpec((1, cup, lbuf), lambda i: (i, 0, 0)),
            pl.BlockSpec((9, cout, cup), lambda i: (0, 0, 0)),
            pl.BlockSpec((cout, 1), lambda i: (0, 0)),
            pl.BlockSpec((9, cout, cout), lambda i: (0, 0, 0)),
            pl.BlockSpec((cout, 1), lambda i: (0, 0)),
            pl.BlockSpec((1, cout, 1), lambda i: (i, 0, 0)),
            pl.BlockSpec((1, cout, 1), lambda i: (i, 0, 0)),
            pl.BlockSpec((1, lext), lambda i: (0, 0)),
        ],
        out_specs=pl.BlockSpec((1, cout, lext), lambda i: (i, 0, 0)),
        scratch_shapes=[pltpu.VMEM((cout, lbuf), jnp.float32)],
        compiler_params=cp,
    )(u_flat, w1t, b1, w2t, b2, fcm, fcv, mask)

    # strip row padding: (N, Cout, H2, Wp)[..., :W2] is already NCHW
    return out_ext.reshape(n, cout, h2, wp)[:, :, :, :w2]


# ----------------------------------------------------------------------------
# Pure-JAX reference (independent NHWC code path) for numerical verification
# ----------------------------------------------------------------------------
def _ref_forward(x_nchw, shared_code, p):
    x = jnp.transpose(x_nchw, (0, 2, 3, 1)).astype(jnp.float32)
    n, h, w, cin = x.shape
    cup = p["up_w"].shape[1]

    # ConvTranspose2d k=2 s=2: out[n,2h+kh,2w+kw,co] = sum_ci x*W[ci,co,kh,kw] + b
    y = jnp.einsum("nhwi,iokl->nhkwlo", x, p["up_w"])
    y = y.reshape(n, 2 * h, 2 * w, cup) + p["up_b"]

    def conv3(xin, wt, b):
        n_, h_, w_, _ = xin.shape
        xp = jnp.pad(xin, ((0, 0), (1, 1), (1, 1), (0, 0)))
        acc = jnp.zeros((n_, h_, w_, wt.shape[0]), jnp.float32)
        for ky in range(3):
            for kx in range(3):
                acc = acc + jnp.einsum("nhwc,oc->nhwo",
                                       xp[:, ky:ky + h_, kx:kx + w_, :],
                                       wt[:, :, ky, kx])
        return acc + b

    def inorm(zz):
        m = jnp.mean(zz, axis=(1, 2), keepdims=True)
        v = jnp.mean(jnp.square(zz - m), axis=(1, 2), keepdims=True)
        return (zz - m) * jax.lax.rsqrt(v + _EPS)

    z = jnp.maximum(inorm(conv3(y, p["c1_w"], p["c1_b"])), 0.0)
    z2 = inorm(conv3(z, p["c2_w"], p["c2_b"]))
    fm = jnp.dot(shared_code, p["fc_mean_w"].T) + p["fc_mean_b"]
    fv = jnp.maximum(jnp.dot(shared_code, p["fc_var_w"].T) + p["fc_var_b"], 0.0)
    out = fv[:, None, None, :] * z2 + fm[:, None, None, :]
    out = jnp.where(out > 0, out, _LRELU_SLOPE * out)
    return jnp.transpose(out, (0, 3, 1, 2))


# ----------------------------------------------------------------------------
if __name__ == "__main__":
    key = jax.random.PRNGKey(0)
    N, in_ch, out_ch, H, W = 2, 8, 4, 8, 8
    initial_channel = 2
    c5 = initial_channel * 16                      # args.initial_channel * 16

    ks = jax.random.split(key, 12)
    params = {
        # ConvTranspose2d(in_ch, in_ch, 2, 2) weight layout: (in, out, kh, kw)
        "up_w": 0.2 * jax.random.normal(ks[0], (in_ch, in_ch, 2, 2), jnp.float32),
        "up_b": 0.1 * jax.random.normal(ks[1], (in_ch,), jnp.float32),
        # Conv2d(in_ch, out_ch, 3) weight layout: (out, in, 3, 3)
        "c1_w": 0.2 * jax.random.normal(ks[2], (out_ch, in_ch, 3, 3), jnp.float32),
        "c1_b": 0.1 * jax.random.normal(ks[3], (out_ch,), jnp.float32),
        "c2_w": 0.2 * jax.random.normal(ks[4], (out_ch, out_ch, 3, 3), jnp.float32),
        "c2_b": 0.1 * jax.random.normal(ks[5], (out_ch,), jnp.float32),
        # Linear(c5, out_ch) weight layout: (out, in)
        "fc_mean_w": 0.2 * jax.random.normal(ks[6], (out_ch, c5), jnp.float32),
        "fc_mean_b": 0.1 * jax.random.normal(ks[7], (out_ch,), jnp.float32),
        "fc_var_w": 0.2 * jax.random.normal(ks[8], (out_ch, c5), jnp.float32),
        "fc_var_b": 0.1 * jax.random.normal(ks[9], (out_ch,), jnp.float32),
    }
    x = jax.random.normal(ks[10], (N, in_ch, H, W), jnp.float32)
    shared_code_dec = jax.random.normal(ks[11], (N, c5), jnp.float32)

    out = jax.block_until_ready(up_conv_forward(x, shared_code_dec, params))
    assert out.shape == (N, out_ch, 2 * H, 2 * W), out.shape

    ref = _ref_forward(x, shared_code_dec, params)
    max_err = float(jnp.max(jnp.abs(out - ref)))
    # Default (non-HIGHEST) MXU precision in the kernel -> slightly loose tol.
    if not bool(jnp.allclose(out, ref, atol=3e-2, rtol=3e-2)):
        raise AssertionError(f"Pallas/reference mismatch, max abs err = {max_err}")

    print("KERNEL_OK")
</pallas_src>

<mosaic_0001>
module attributes {stable_mosaic.version = 11 : i64} {
  func.func @_upsample_kernel(%arg0: i32, %arg1: memref<1x8x64xf32, #tpu.memory_space<vmem>>, %arg2: memref<32x8xf32, #tpu.memory_space<vmem>>, %arg3: memref<32x1xf32, #tpu.memory_space<vmem>>, %arg4: memref<1x32x64xf32, #tpu.memory_space<vmem>>) attributes {dimension_semantics = [#tpu.dimension_semantics<parallel>], iteration_bounds = array<i64: 2>, scalar_prefetch = 0 : i64, scratch_operands = 0 : i64, tpu.core_type = #tpu.core_type<tc>, window_params = [{transform_indices = @transform_0, window_bounds = array<i64: 1, 8, 64>}, {pipeline_mode = #tpu.pipeline_mode<synchronous>, transform_indices = @transform_1, window_bounds = array<i64: 32, 8>}, {pipeline_mode = #tpu.pipeline_mode<synchronous>, transform_indices = @transform_2, window_bounds = array<i64: 32, 1>}, {transform_indices = @transform_3, window_bounds = array<i64: 1, 32, 64>}]} {
    %c0 = arith.constant 0 : index
    %c0_0 = arith.constant 0 : index
    %0 = vector.load %arg2[%c0, %c0_0] : memref<32x8xf32, #tpu.memory_space<vmem>>, vector<32x8xf32>
    %c0_1 = arith.constant 0 : index
    %c0_2 = arith.constant 0 : index
    %c0_3 = arith.constant 0 : index
    %1 = vector.load %arg1[%c0_1, %c0_2, %c0_3] : memref<1x8x64xf32, #tpu.memory_space<vmem>>, vector<1x8x64xf32>
    %2 = vector.shape_cast %1 : vector<1x8x64xf32> to vector<8x64xf32>
    %cst = arith.constant dense<0.000000e+00> : vector<32x64xf32>
    %3 = tpu.matmul %0, %2, %cst {dimension_numbers = #tpu.dot_dimension_numbers<[1], [0], [0], [1], [0, 0, 1, 1], [], []>} : vector<32x8xf32>, vector<8x64xf32>, vector<32x64xf32> -> vector<32x64xf32>
    %c0_4 = arith.constant 0 : index
    %c0_5 = arith.constant 0 : index
    %4 = vector.load %arg3[%c0_4, %c0_5] : memref<32x1xf32, #tpu.memory_space<vmem>>, vector<32x1xf32>
    %5 = vector.broadcast %4 : vector<32x1xf32> to vector<32x64xf32>
    %6 = arith.addf %3, %5 : vector<32x64xf32>
    %c0_6 = arith.constant 0 : index
    %c0_7 = arith.constant 0 : index
    %c0_8 = arith.constant 0 : index
    %7 = vector.load %arg4[%c0_6, %c0_7, %c0_8] : memref<1x32x64xf32, #tpu.memory_space<vmem>>, vector<1x32x64xf32>
    %8 = vector.shape_cast %7 : vector<1x32x64xf32> to vector<32x64xf32>
    %9 = vector.shape_cast %6 : vector<32x64xf32> to vector<1x32x64xf32>
    tpu.vector_store %arg4[%c0_6, %c0_7, %c0_8], %9 {strides = array<i32>} : memref<1x32x64xf32, #tpu.memory_space<vmem>>, vector<1x32x64xf32>,
    return
  }
  func.func @transform_0(%arg0: i32) -> (i32, i32, i32) {
    %c0_i32 = arith.constant 0 : i32
    %c0_i32_0 = arith.constant 0 : i32
    %c0_i32_1 = arith.constant 0 : i32
    return %arg0, %c0_i32, %c0_i32_0 : i32, i32, i32
  }
  func.func @transform_1(%arg0: i32) -> (i32, i32) {
    %c0_i32 = arith.constant 0 : i32
    %c0_i32_0 = arith.constant 0 : i32
    %c0_i32_1 = arith.constant 0 : i32
    return %c0_i32, %c0_i32_0 : i32, i32
  }
  func.func @transform_2(%arg0: i32) -> (i32, i32) {
    %c0_i32 = arith.constant 0 : i32
    %c0_i32_0 = arith.constant 0 : i32
    %c0_i32_1 = arith.constant 0 : i32
    return %c0_i32, %c0_i32_0 : i32, i32
  }
  func.func @transform_3(%arg0: i32) -> (i32, i32, i32) {
    %c0_i32 = arith.constant 0 : i32
    %c0_i32_0 = arith.constant 0 : i32
    %c0_i32_1 = arith.constant 0 : i32
    return %arg0, %c0_i32, %c0_i32_0 : i32, i32, i32
  }
}

module attributes {stable_mosaic.version = 11 : i64} {
  func.func @_fused_conv_kernel(%arg0: i32, %arg1: memref<1x8x342xf32, #tpu.memory_space<vmem>>, %arg2: memref<9x4x8xf32, #tpu.memory_space<vmem>>, %arg3: memref<4x1xf32, #tpu.memory_space<vmem>>, %arg4: memref<9x4x4xf32, #tpu.memory_space<vmem>>, %arg5: memref<4x1xf32, #tpu.memory_space<vmem>>, %arg6: memref<1x4x1xf32, #tpu.memory_space<vmem>>, %arg7: memref<1x4x1xf32, #tpu.memory_space<vmem>>, %arg8: memref<1x288xf32, #tpu.memory_space<vmem>>, %arg9: memref<1x4x288xf32, #tpu.memory_space<vmem>>, %arg10: memref<4x342xf32, #tpu.memory_space<vmem>>) attributes {dimension_semantics = [#tpu.dimension_semantics<parallel>], iteration_bounds = array<i64: 2>, scalar_prefetch = 0 : i64, scratch_operands = 1 : i64, tpu.core_type = #tpu.core_type<tc>, window_params = [{transform_indices = @transform_0, window_bounds = array<i64: 1, 8, 342>}, {pipeline_mode = #tpu.pipeline_mode<synchronous>, transform_indices = @transform_1, window_bounds = array<i64: 9, 4, 8>}, {pipeline_mode = #tpu.pipeline_mode<synchronous>, transform_indices = @transform_2, window_bounds = array<i64: 4, 1>}, {pipeline_mode = #tpu.pipeline_mode<synchronous>, transform_indices = @transform_3, window_bounds = array<i64: 9, 4, 4>}, {pipeline_mode = #tpu.pipeline_mode<synchronous>, transform_indices = @transform_4, window_bounds = array<i64: 4, 1>}, {transform_indices = @transform_5, window_bounds = array<i64: 1, 4, 1>}, {transform_indices = @transform_6, window_bounds = array<i64: 1, 4, 1>}, {pipeline_mode = #tpu.pipeline_mode<synchronous>, transform_indices = @transform_7, window_bounds = array<i64: 1, 288>}, {transform_indices = @transform_8, window_bounds = array<i64: 1, 4, 288>}]} {
    %c0 = arith.constant 0 : index
    %c0_0 = arith.constant 0 : index
    %c0_1 = arith.constant 0 : index
    %0 = vector.load %arg1[%c0, %c0_0, %c0_1] : memref<1x8x342xf32, #tpu.memory_space<vmem>>, vector<1x8x342xf32>
    %1 = vector.shape_cast %0 : vector<1x8x342xf32> to vector<8x342xf32>
    %c0_2 = arith.constant 0 : index
    %c0_3 = arith.constant 0 : index
    %2 = vector.load %arg8[%c0_2, %c0_3] : memref<1x288xf32, #tpu.memory_space<vmem>>, vector<1x288xf32>
    %c0_4 = arith.constant 0 : index
    %c0_5 = arith.constant 0 : index
    %3 = vector.load %arg3[%c0_4, %c0_5] : memref<4x1xf32, #tpu.memory_space<vmem>>, vector<4x1xf32>
    %cst = arith.constant 0.000000e+00 : f32
    %4 = vector.broadcast %cst : f32 to vector<4x288xf32>
    %c0_6 = arith.constant 0 : index
    %c0_7 = arith.constant 0 : index
    %c0_8 = arith.constant 0 : index
    %5 = vector.load %arg2[%c0_6, %c0_7, %c0_8] : memref<9x4x8xf32, #tpu.memory_space<vmem>>, vector<1x4x8xf32>
    %6 = vector.shape_cast %5 : vector<1x4x8xf32> to vector<4x8xf32>
    %7 = vector.extract_strided_slice %1 {offsets = [0, 0], sizes = [8, 288], strides = [1, 1]} : vector<8x342xf32> to vector<8x288xf32>
    %cst_9 = arith.constant dense<0.000000e+00> : vector<4x288xf32>
    %8 = tpu.matmul %6, %7, %cst_9 {dimension_numbers = #tpu.dot_dimension_numbers<[1], [0], [0], [1], [0, 0, 1, 1], [], []>} : vector<4x8xf32>, vector<8x288xf32>, vector<4x288xf32> -> vector<4x288xf32>
    %9 = arith.addf %4, %8 : vector<4x288xf32>
    %c1 = arith.constant 1 : index
    %c0_10 = arith.constant 0 : index
    %c0_11 = arith.constant 0 : index
    %10 = vector.load %arg2[%c1, %c0_10, %c0_11] : memref<9x4x8xf32, #tpu.memory_space<vmem>>, vector<1x4x8xf32>
    %11 = vector.shape_cast %10 : vector<1x4x8xf32> to vector<4x8xf32>
    %12 = vector.extract_strided_slice %1 {offsets = [0, 1], sizes = [8, 288], strides = [1, 1]} : vector<8x342xf32> to vector<8x288xf32>
    %cst_12 = arith.constant dense<0.000000e+00> : vector<4x288xf32>
    %13 = tpu.matmul %11, %12, %cst_12 {dimension_numbers = #tpu.dot_dimension_numbers<[1], [0], [0], [1], [0, 0, 1, 1], [], []>} : vector<4x8xf32>, vector<8x288xf32>, vector<4x288xf32> -> vector<4x288xf32>
    %14 = arith.addf %9, %13 : vector<4x288xf32>
    %c2 = arith.constant 2 : index
    %c0_13 = arith.constant 0 : index
    %c0_14 = arith.constant 0 : index
    %15 = vector.load %arg2[%c2, %c0_13, %c0_14] : memref<9x4x8xf32, #tpu.memory_space<vmem>>, vector<1x4x8xf32>
    %16 = vector.shape_cast %15 : vector<1x4x8xf32> to vector<4x8xf32>
    %17 = vector.extract_strided_slice %1 {offsets = [0, 2], sizes = [8, 288], strides = [1, 1]} : vector<8x342xf32> to vector<8x288xf32>
    %cst_15 = arith.constant dense<0.000000e+00> : vector<4x288xf32>
    %18 = tpu.matmul %16, %17, %cst_15 {dimension_numbers = #tpu.dot_dimension_numbers<[1], [0], [0], [1], [0, 0, 1, 1], [], []>} : vector<4x8xf32>, vector<8x288xf32>, vector<4x288xf32> -> vector<4x288xf32>
    %19 = arith.addf %14, %18 : vector<4x288xf32>
    %c3 = arith.constant 3 : index
    %c0_16 = arith.constant 0 : index
    %c0_17 = arith.constant 0 : index
    %20 = vector.load %arg2[%c3, %c0_16, %c0_17] : memref<9x4x8xf32, #tpu.memory_space<vmem>>, vector<1x4x8xf32>
    %21 = vector.shape_cast %20 : vector<1x4x8xf32> to vector<4x8xf32>
    %22 = vector.extract_strided_slice %1 {offsets = [0, 18], sizes = [8, 288], strides = [1, 1]} : vector<8x342xf32> to vector<8x288xf32>
    %cst_18 = arith.constant dense<0.000000e+00> : vector<4x288xf32>
    %23 = tpu.matmul %21, %22, %cst_18 {dimension_numbers = #tpu.dot_dimension_numbers<[1], [0], [0], [1], [0, 0, 1, 1], [], []>} : vector<4x8xf32>, vector<8x288xf32>, vector<4x288xf32> -> vector<4x288xf32>
    %24 = arith.addf %19, %23 : vector<4x288xf32>
    %c4 = arith.constant 4 : index
    %c0_19 = arith.constant 0 : index
    %c0_20 = arith.constant 0 : index
    %25 = vector.load %arg2[%c4, %c0_19, %c0_20] : memref<9x4x8xf32, #tpu.memory_space<vmem>>, vector<1x4x8xf32>
    %26 = vector.shape_cast %25 : vector<1x4x8xf32> to vector<4x8xf32>
    %27 = vector.extract_strided_slice %1 {offsets = [0, 19], sizes = [8, 288], strides = [1, 1]} : vector<8x342xf32> to vector<8x288xf32>
    %cst_21 = arith.constant dense<0.000000e+00> : vector<4x288xf32>
    %28 = tpu.matmul %26, %27, %cst_21 {dimension_numbers = #tpu.dot_dimension_numbers<[1], [0], [0], [1], [0, 0, 1, 1], [], []>} : vector<4x8xf32>, vector<8x288xf32>, vector<4x288xf32> -> vector<4x288xf32>
    %29 = arith.addf %24, %28 : vector<4x288xf32>
    %c5 = arith.constant 5 : index
    %c0_22 = arith.constant 0 : index
    %c0_23 = arith.constant 0 : index
    %30 = vector.load %arg2[%c5, %c0_22, %c0_23] : memref<9x4x8xf32, #tpu.memory_space<vmem>>, vector<1x4x8xf32>
    %31 = vector.shape_cast %30 : vector<1x4x8xf32> to vector<4x8xf32>
    %32 = vector.extract_strided_slice %1 {offsets = [0, 20], sizes = [8, 288], strides = [1, 1]} : vector<8x342xf32> to vector<8x288xf32>
    %cst_24 = arith.constant dense<0.000000e+00> : vector<4x288xf32>
    %33 = tpu.matmul %31, %32, %cst_24 {dimension_numbers = #tpu.dot_dimension_numbers<[1], [0], [0], [1], [0, 0, 1, 1], [], []>} : vector<4x8xf32>, vector<8x288xf32>, vector<4x288xf32> -> vector<4x288xf32>
    %34 = arith.addf %29, %33 : vector<4x288xf32>
    %c6 = arith.constant 6 : index
    %c0_25 = arith.constant 0 : index
    %c0_26 = arith.constant 0 : index
    %35 = vector.load %arg2[%c6, %c0_25, %c0_26] : memref<9x4x8xf32, #tpu.memory_space<vmem>>, vector<1x4x8xf32>
    %36 = vector.shape_cast %35 : vector<1x4x8xf32> to vector<4x8xf32>
    %37 = vector.extract_strided_slice %1 {offsets = [0, 36], sizes = [8, 288], strides = [1, 1]} : vector<8x342xf32> to vector<8x288xf32>
    %cst_27 = arith.constant dense<0.000000e+00> : vector<4x288xf32>
    %38 = tpu.matmul %36, %37, %cst_27 {dimension_numbers = #tpu.dot_dimension_numbers<[1], [0], [0], [1], [0, 0, 1, 1], [], []>} : vector<4x8xf32>, vector<8x288xf32>, vector<4x288xf32> -> vector<4x288xf32>
    %39 = arith.addf %34, %38 : vector<4x288xf32>
    %c7 = arith.constant 7 : index
    %c0_28 = arith.constant 0 : index
    %c0_29 = arith.constant 0 : index
    %40 = vector.load %arg2[%c7, %c0_28, %c0_29] : memref<9x4x8xf32, #tpu.memory_space<vmem>>, vector<1x4x8xf32>
    %41 = vector.shape_cast %40 : vector<1x4x8xf32> to vector<4x8xf32>
    %42 = vector.extract_strided_slice %1 {offsets = [0, 37], sizes = [8, 288], strides = [1, 1]} : vector<8x342xf32> to vector<8x288xf32>
    %cst_30 = arith.constant dense<0.000000e+00> : vector<4x288xf32>
    %43 = tpu.matmul %41, %42, %cst_30 {dimension_numbers = #tpu.dot_dimension_numbers<[1], [0], [0], [1], [0, 0, 1, 1], [], []>} : vector<4x8xf32>, vector<8x288xf32>, vector<4x288xf32> -> vector<4x288xf32>
    %44 = arith.addf %39, %43 : vector<4x288xf32>
    %c8 = arith.constant 8 : index
    %c0_31 = arith.constant 0 : index
    %c0_32 = arith.constant 0 : index
    %45 = vector.load %arg2[%c8, %c0_31, %c0_32] : memref<9x4x8xf32, #tpu.memory_space<vmem>>, vector<1x4x8xf32>
    %46 = vector.shape_cast %45 : vector<1x4x8xf32> to vector<4x8xf32>
    %47 = vector.extract_strided_slice %1 {offsets = [0, 38], sizes = [8, 288], strides = [1, 1]} : vector<8x342xf32> to vector<8x288xf32>
    %cst_33 = arith.constant dense<0.000000e+00> : vector<4x288xf32>
    %48 = tpu.matmul %46, %47, %cst_33 {dimension_numbers = #tpu.dot_dimension_numbers<[1], [0], [0], [1], [0, 0, 1, 1], [], []>} : vector<4x8xf32>, vector<8x288xf32>, vector<4x288xf32> -> vector<4x288xf32>
    %49 = arith.addf %44, %48 : vector<4x288xf32>
    %50 = vector.broadcast %3 : vector<4x1xf32> to vector<4x288xf32>
    %51 = arith.addf %49, %50 : vector<4x288xf32>
    %52 = vector.broadcast %2 : vector<1x288xf32> to vector<4x288xf32>
    %53 = arith.mulf %51, %52 : vector<4x288xf32>
    %cst_34 = arith.constant dense<0.000000e+00> : vector<4xf32>
    %54 = vector.multi_reduction <add>, %53, %cst_34 [1] : vector<4x288xf32> to vector<4xf32>
    %55 = vector.shape_cast %54 : vector<4xf32> to vector<4x1xf32>
    %cst_35 = arith.constant 3.906250e-03 : f32
    %56 = vector.broadcast %cst_35 : f32 to vector<4x1xf32>
    %57 = arith.mulf %55, %56 : vector<4x1xf32>
    %58 = vector.broadcast %57 : vector<4x1xf32> to vector<4x288xf32>
    %59 = arith.subf %51, %58 : vector<4x288xf32>
    %60 = vector.broadcast %2 : vector<1x288xf32> to vector<4x288xf32>
    %61 = arith.mulf %59, %60 : vector<4x288xf32>
    %62 = arith.mulf %61, %61 : vector<4x288xf32>
    %cst_36 = arith.constant dense<0.000000e+00> : vector<4xf32>
    %63 = vector.multi_reduction <add>, %62, %cst_36 [1] : vector<4x288xf32> to vector<4xf32>
    %64 = vector.shape_cast %63 : vector<4xf32> to vector<4x1xf32>
    %cst_37 = arith.constant 3.906250e-03 : f32
    %65 = vector.broadcast %cst_37 : f32 to vector<4x1xf32>
    %66 = arith.mulf %64, %65 : vector<4x1xf32>
    %cst_38 = arith.constant 9.99999974E-6 : f32
    %67 = vector.broadcast %cst_38 : f32 to vector<4x1xf32>
    %68 = arith.addf %66, %67 : vector<4x1xf32>
    %69 = math.rsqrt %68 : vector<4x1xf32>
    %70 = vector.broadcast %69 : vector<4x1xf32> to vector<4x288xf32>
    %71 = arith.mulf %61, %70 : vector<4x288xf32>
    %cst_39 = arith.constant 0.000000e+00 : f32
    %72 = vector.broadcast %cst_39 : f32 to vector<4x288xf32>
    %73 = arith.maximumf %71, %72 : vector<4x288xf32>
    %cst_40 = arith.constant 0.000000e+00 : f32
    %74 = vector.broadcast %cst_40 : f32 to vector<4x342xf32>
    %c0_41 = arith.constant 0 : index
    %c0_42 = arith.constant 0 : index
    %75 = vector.load %arg10[%c0_41, %c0_42] : memref<4x342xf32, #tpu.memory_space<vmem>>, vector<4x342xf32>
    tpu.vector_store %arg10[%c0_41, %c0_42], %74 {strides = array<i32>} : memref<4x342xf32, #tpu.memory_space<vmem>>, vector<4x342xf32>,
    %c0_43 = arith.constant 0 : index
    %c19 = arith.constant 19 : index
    %76 = vector.load %arg10[%c0_43, %c19] : memref<4x342xf32, #tpu.memory_space<vmem>>, vector<4x288xf32>
    tpu.vector_store %arg10[%c0_43, %c19], %73 {strides = array<i32>} : memref<4x342xf32, #tpu.memory_space<vmem>>, vector<4x288xf32>,
    %c0_44 = arith.constant 0 : index
    %c0_45 = arith.constant 0 : index
    %77 = vector.load %arg10[%c0_44, %c0_45] : memref<4x342xf32, #tpu.memory_space<vmem>>, vector<4x342xf32>
    %c0_46 = arith.constant 0 : index
    %c0_47 = arith.constant 0 : index
    %78 = vector.load %arg5[%c0_46, %c0_47] : memref<4x1xf32, #tpu.memory_space<vmem>>, vector<4x1xf32>
    %cst_48 = arith.constant 0.000000e+00 : f32
    %79 = vector.broadcast %cst_48 : f32 to vector<4x288xf32>
    %c0_49 = arith.constant 0 : index
    %c0_50 = arith.constant 0 : index
    %c0_51 = arith.constant 0 : index
    %80 = vector.load %arg4[%c0_49, %c0_50, %c0_51] : memref<9x4x4xf32, #tpu.memory_space<vmem>>, vector<1x4x4xf32>
    %81 = vector.shape_cast %80 : vector<1x4x4xf32> to vector<4x4xf32>
    %82 = vector.extract_strided_slice %77 {offsets = [0, 0], sizes = [4, 288], strides = [1, 1]} : vector<4x342xf32> to vector<4x288xf32>
    %cst_52 = arith.constant dense<0.000000e+00> : vector<4x288xf32>
    %83 = tpu.matmul %81, %82, %cst_52 {dimension_numbers = #tpu.dot_dimension_numbers<[1], [0], [0], [1], [0, 0, 1, 1], [], []>} : vector<4x4xf32>, vector<4x288xf32>, vector<4x288xf32> -> vector<4x288xf32>
    %84 = arith.addf %79, %83 : vector<4x288xf32>
    %c1_53 = arith.constant 1 : index
    %c0_54 = arith.constant 0 : index
    %c0_55 = arith.constant 0 : index
    %85 = vector.load %arg4[%c1_53, %c0_54, %c0_55] : memref<9x4x4xf32, #tpu.memory_space<vmem>>, vector<1x4x4xf32>
    %86 = vector.shape_cast %85 : vector<1x4x4xf32> to vector<4x4xf32>
    %87 = vector.extract_strided_slice %77 {offsets = [0, 1], sizes = [4, 288], strides = [1, 1]} : vector<4x342xf32> to vector<4x288xf32>
    %cst_56 = arith.constant dense<0.000000e+00> : vector<4x288xf32>
    %88 = tpu.matmul %86, %87, %cst_56 {dimension_numbers = #tpu.dot_dimension_numbers<[1], [0], [0], [1], [0, 0, 1, 1], [], []>} : vector<4x4xf32>, vector<4x288xf32>, vector<4x288xf32> -> vector<4x288xf32>
    %89 = arith.addf %84, %88 : vector<4x288xf32>
    %c2_57 = arith.constant 2 : index
    %c0_58 = arith.constant 0 : index
    %c0_59 = arith.constant 0 : index
    %90 = vector.load %arg4[%c2_57, %c0_58, %c0_59] : memref<9x4x4xf32, #tpu.memory_space<vmem>>, vector<1x4x4xf32>
    %91 = vector.shape_cast %90 : vector<1x4x4xf32> to vector<4x4xf32>
    %92 = vector.extract_strided_slice %77 {offsets = [0, 2], sizes = [4, 288], strides = [1, 1]} : vector<4x342xf32> to vector<4x288xf32>
    %cst_60 = arith.constant dense<0.000000e+00> : vector<4x288xf32>
    %93 = tpu.matmul %91, %92, %cst_60 {dimension_numbers = #tpu.dot_dimension_numbers<[1], [0], [0], [1], [0, 0, 1, 1], [], []>} : vector<4x4xf32>, vector<4x288xf32>, vector<4x288xf32> -> vector<4x288xf32>
    %94 = arith.addf %89, %93 : vector<4x288xf32>
    %c3_61 = arith.constant 3 : index
    %c0_62 = arith.constant 0 : index
    %c0_63 = arith.constant 0 : index
    %95 = vector.load %arg4[%c3_61, %c0_62, %c0_63] : memref<9x4x4xf32, #tpu.memory_space<vmem>>, vector<1x4x4xf32>
    %96 = vector.shape_cast %95 : vector<1x4x4xf32> to vector<4x4xf32>
    %97 = vector.extract_strided_slice %77 {offsets = [0, 18], sizes = [4, 288], strides = [1, 1]} : vector<4x342xf32> to vector<4x288xf32>
    %cst_64 = arith.constant dense<0.000000e+00> : vector<4x288xf32>
    %98 = tpu.matmul %96, %97, %cst_64 {dimension_numbers = #tpu.dot_dimension_numbers<[1], [0], [0], [1], [0, 0, 1, 1], [], []>} : vector<4x4xf32>, vector<4x288xf32>, vector<4x288xf32> -> vector<4x288xf32>
    %99 = arith.addf %94, %98 : vector<4x288xf32>
    %c4_65 = arith.constant 4 : index
    %c0_66 = arith.constant 0 : index
    %c0_67 = arith.constant 0 : index
    %100 = vector.load %arg4[%c4_65, %c0_66, %c0_67] : memref<9x4x4xf32, #tpu.memory_space<vmem>>, vector<1x4x4xf32>
    %101 = vector.shape_cast %100 : vector<1x4x4xf32> to vector<4x4xf32>
    %102 = vector.extract_strided_slice %77 {offsets = [0, 19], sizes = [4, 288], strides = [1, 1]} : vector<4x342xf32> to vector<4x288xf32>
    %cst_68 = arith.constant dense<0.000000e+00> : vector<4x288xf32>
    %103 = tpu.matmul %101, %102, %cst_68 {dimension_numbers = #tpu.dot_dimension_numbers<[1], [0], [0], [1], [0, 0, 1, 1], [], []>} : vector<4x4xf32>, vector<4x288xf32>, vector<4x288xf32> -> vector<4x288xf32>
    %104 = arith.addf %99, %103 : vector<4x288xf32>
    %c5_69 = arith.constant 5 : index
    %c0_70 = arith.constant 0 : index
    %c0_71 = arith.constant 0 : index
    %105 = vector.load %arg4[%c5_69, %c0_70, %c0_71] : memref<9x4x4xf32, #tpu.memory_space<vmem>>, vector<1x4x4xf32>
    %106 = vector.shape_cast %105 : vector<1x4x4xf32> to vector<4x4xf32>
    %107 = vector.extract_strided_slice %77 {offsets = [0, 20], sizes = [4, 288], strides = [1, 1]} : vector<4x342xf32> to vector<4x288xf32>
    %cst_72 = arith.constant dense<0.000000e+00> : vector<4x288xf32>
    %108 = tpu.matmul %106, %107, %cst_72 {dimension_numbers = #tpu.dot_dimension_numbers<[1], [0], [0], [1], [0, 0, 1, 1], [], []>} : vector<4x4xf32>, vector<4x288xf32>, vector<4x288xf32> -> vector<4x288xf32>
    %109 = arith.addf %104, %108 : vector<4x288xf32>
    %c6_73 = arith.constant 6 : index
    %c0_74 = arith.constant 0 : index
    %c0_75 = arith.constant 0 : index
    %110 = vector.load %arg4[%c6_73, %c0_74, %c0_75] : memref<9x4x4xf32, #tpu.memory_space<vmem>>, vector<1x4x4xf32>
    %111 = vector.shape_cast %110 : vector<1x4x4xf32> to vector<4x4xf32>
    %112 = vector.extract_strided_slice %77 {offsets = [0, 36], sizes = [4, 288], strides = [1, 1]} : vector<4x342xf32> to vector<4x288xf32>
    %cst_76 = arith.constant dense<0.000000e+00> : vector<4x288xf32>
    %113 = tpu.matmul %111, %112, %cst_76 {dimension_numbers = #tpu.dot_dimension_numbers<[1], [0], [0], [1], [0, 0, 1, 1], [], []>} : vector<4x4xf32>, vector<4x288xf32>, vector<4x288xf32> -> vector<4x288xf32>
    %114 = arith.addf %109, %113 : vector<4x288xf32>
    %c7_77 = arith.constant 7 : index
    %c0_78 = arith.constant 0 : index
    %c0_79 = arith.constant 0 : index
    %115 = vector.load %arg4[%c7_77, %c0_78, %c0_79] : memref<9x4x4xf32, #tpu.memory_space<vmem>>, vector<1x4x4xf32>
    %116 = vector.shape_cast %115 : vector<1x4x4xf32> to vector<4x4xf32>
    %117 = vector.extract_strided_slice %77 {offsets = [0, 37], sizes = [4, 288], strides = [1, 1]} : vector<4x342xf32> to vector<4x288xf32>
    %cst_80 = arith.constant dense<0.000000e+00> : vector<4x288xf32>
    %118 = tpu.matmul %116, %117, %cst_80 {dimension_numbers = #tpu.dot_dimension_numbers<[1], [0], [0], [1], [0, 0, 1, 1], [], []>} : vector<4x4xf32>, vector<4x288xf32>, vector<4x288xf32> -> vector<4x288xf32>
    %119 = arith.addf %114, %118 : vector<4x288xf32>
    %c8_81 = arith.constant 8 : index
    %c0_82 = arith.constant 0 : index
    %c0_83 = arith.constant 0 : index
    %120 = vector.load %arg4[%c8_81, %c0_82, %c0_83] : memref<9x4x4xf32, #tpu.memory_space<vmem>>, vector<1x4x4xf32>
    %121 = vector.shape_cast %120 : vector<1x4x4xf32> to vector<4x4xf32>
    %122 = vector.extract_strided_slice %77 {offsets = [0, 38], sizes = [4, 288], strides = [1, 1]} : vector<4x342xf32> to vector<4x288xf32>
    %cst_84 = arith.constant dense<0.000000e+00> : vector<4x288xf32>
    %123 = tpu.matmul %121, %122, %cst_84 {dimension_numbers = #tpu.dot_dimension_numbers<[1], [0], [0], [1], [0, 0, 1, 1], [], []>} : vector<4x4xf32>, vector<4x288xf32>, vector<4x288xf32> -> vector<4x288xf32>
    %124 = arith.addf %119, %123 : vector<4x288xf32>
    %125 = vector.broadcast %78 : vector<4x1xf32> to vector<4x288xf32>
    %126 = arith.addf %124, %125 : vector<4x288xf32>
    %127 = vector.broadcast %2 : vector<1x288xf32> to vector<4x288xf32>
    %128 = arith.mulf %126, %127 : vector<4x288xf32>
    %cst_85 = arith.constant dense<0.000000e+00> : vector<4xf32>
    %129 = vector.multi_reduction <add>, %128, %cst_85 [1] : vector<4x288xf32> to vector<4xf32>
    %130 = vector.shape_cast %129 : vector<4xf32> to vector<4x1xf32>
    %cst_86 = arith.constant 3.906250e-03 : f32
    %131 = vector.broadcast %cst_86 : f32 to vector<4x1xf32>
    %132 = arith.mulf %130, %131 : vector<4x1xf32>
    %133 = vector.broadcast %132 : vector<4x1xf32> to vector<4x288xf32>
    %134 = arith.subf %126, %133 : vector<4x288xf32>
    %135 = vector.broadcast %2 : vector<1x288xf32> to vector<4x288xf32>
    %136 = arith.mulf %134, %135 : vector<4x288xf32>
    %137 = arith.mulf %136, %136 : vector<4x288xf32>
    %cst_87 = arith.constant dense<0.000000e+00> : vector<4xf32>
    %138 = vector.multi_reduction <add>, %137, %cst_87 [1] : vector<4x288xf32> to vector<4xf32>
    %139 = vector.shape_cast %138 : vector<4xf32> to vector<4x1xf32>
    %cst_88 = arith.constant 3.906250e-03 : f32
    %140 = vector.broadcast %cst_88 : f32 to vector<4x1xf32>
    %141 = arith.mulf %139, %140 : vector<4x1xf32>
    %cst_89 = arith.constant 9.99999974E-6 : f32
    %142 = vector.broadcast %cst_89 : f32 to vector<4x1xf32>
    %143 = arith.addf %141, %142 : vector<4x1xf32>
    %144 = math.rsqrt %143 : vector<4x1xf32>
    %145 = vector.broadcast %144 : vector<4x1xf32> to vector<4x288xf32>
    %146 = arith.mulf %136, %145 : vector<4x288xf32>
    %c0_90 = arith.constant 0 : index
    %c0_91 = arith.constant 0 : index
    %c0_92 = arith.constant 0 : index
    %147 = vector.load %arg7[%c0_90, %c0_91, %c0_92] : memref<1x4x1xf32, #tpu.memory_space<vmem>>, vector<1x4x1xf32>
    %148 = vector.shape_cast %147 : vector<1x4x1xf32> to vector<4x1xf32>
    %149 = vector.broadcast %148 : vector<4x1xf32> to vector<4x288xf32>
    %150 = arith.mulf %149, %146 : vector<4x288xf32>
    %c0_93 = arith.constant 0 : index
    %c0_94 = arith.constant 0 : index
    %c0_95 = arith.constant 0 : index
    %151 = vector.load %arg6[%c0_93, %c0_94, %c0_95] : memref<1x4x1xf32, #tpu.memory_space<vmem>>, vector<1x4x1xf32>
    %152 = vector.shape_cast %151 : vector<1x4x1xf32> to vector<4x1xf32>
    %153 = vector.broadcast %152 : vector<4x1xf32> to vector<4x288xf32>
    %154 = arith.addf %150, %153 : vector<4x288xf32>
    %cst_96 = arith.constant 0.000000e+00 : f32
    %155 = vector.broadcast %cst_96 : f32 to vector<4x288xf32>
    %156 = arith.cmpf ogt, %154, %155 : vector<4x288xf32>
    %cst_97 = arith.constant 0.00999999977 : f32
    %157 = vector.broadcast %cst_97 : f32 to vector<4x288xf32>
    %158 = arith.mulf %157, %154 : vector<4x288xf32>
    %159 = arith.select %156, %154, %158 : vector<4x288xi1>, vector<4x288xf32>
    %c0_98 = arith.constant 0 : index
    %c0_99 = arith.constant 0 : index
    %c0_100 = arith.constant 0 : index
    %160 = vector.load %arg9[%c0_98, %c0_99, %c0_100] : memref<1x4x288xf32, #tpu.memory_space<vmem>>, vector<1x4x288xf32>
    %161 = vector.shape_cast %160 : vector<1x4x288xf32> to vector<4x288xf32>
    %162 = vector.shape_cast %159 : vector<4x288xf32> to vector<1x4x288xf32>
    tpu.vector_store %arg9[%c0_98, %c0_99, %c0_100], %162 {strides = array<i32>} : memref<1x4x288xf32, #tpu.memory_space<vmem>>, vector<1x4x288xf32>,
    return
  }
  func.func @transform_0(%arg0: i32) -> (i32, i32, i32) {
    %c0_i32 = arith.constant 0 : i32
    %c0_i32_0 = arith.constant 0 : i32
    %c0_i32_1 = arith.constant 0 : i32
    return %arg0, %c0_i32, %c0_i32_0 : i32, i32, i32
  }
  func.func @transform_1(%arg0: i32) -> (i32, i32, i32) {
    %c0_i32 = arith.constant 0 : i32
    %c0_i32_0 = arith.constant 0 : i32
    %c0_i32_1 = arith.constant 0 : i32
    %c0_i32_2 = arith.constant 0 : i32
    return %c0_i32, %c0_i32_0, %c0_i32_1 : i32, i32, i32
  }
  func.func @transform_2(%arg0: i32) -> (i32, i32) {
    %c0_i32 = arith.constant 0 : i32
    %c0_i32_0 = arith.constant 0 : i32
    %c0_i32_1 = arith.constant 0 : i32
    return %c0_i32, %c0_i32_0 : i32, i32
  }
  func.func @transform_3(%arg0: i32) -> (i32, i32, i32) {
    %c0_i32 = arith.constant 0 : i32
    %c0_i32_0 = arith.constant 0 : i32
    %c0_i32_1 = arith.constant 0 : i32
    %c0_i32_2 = arith.constant 0 : i32
    return %c0_i32, %c0_i32_0, %c0_i32_1 : i32, i32, i32
  }
  func.func @transform_4(%arg0: i32) -> (i32, i32) {
    %c0_i32 = arith.constant 0 : i32
    %c0_i32_0 = arith.constant 0 : i32
    %c0_i32_1 = arith.constant 0 : i32
    return %c0_i32, %c0_i32_0 : i32, i32
  }
  func.func @transform_5(%arg0: i32) -> (i32, i32, i32) {
    %c0_i32 = arith.constant 0 : i32
    %c0_i32_0 = arith.constant 0 : i32
    %c0_i32_1 = arith.constant 0 : i32
    return %arg0, %c0_i32, %c0_i32_0 : i32, i32, i32
  }
  func.func @transform_6(%arg0: i32) -> (i32, i32, i32) {
    %c0_i32 = arith.constant 0 : i32
    %c0_i32_0 = arith.constant 0 : i32
    %c0_i32_1 = arith.constant 0 : i32
    return %arg0, %c0_i32, %c0_i32_0 : i32, i32, i32
  }
  func.func @transform_7(%arg0: i32) -> (i32, i32) {
    %c0_i32 = arith.constant 0 : i32
    %c0_i32_0 = arith.constant 0 : i32
    %c0_i32_1 = arith.constant 0 : i32
    return %c0_i32, %c0_i32_0 : i32, i32
  }
  func.func @transform_8(%arg0: i32) -> (i32, i32, i32) {
    %c0_i32 = arith.constant 0 : i32
    %c0_i32_0 = arith.constant 0 : i32
    %c0_i32_1 = arith.constant 0 : i32
    return %arg0, %c0_i32, %c0_i32_0 : i32, i32, i32
  }
}

</mosaic_0001>

<bundles_post_ra>
// kernel: tile.8
= control target key start
LH: loop header
LB: loop body
LE: loop exit
PB: predicated region body
PF: predicated region fallthrough
CT: control target
= control target key end

     0   :  { %s22_s0 = inlined_call_operand.vmem [shape: f32[8], index: 0, kind: input, shape index: {}]   ;;  %s23_s1 = inlined_call_operand.vmem [shape: f32[4,8], index: 1, kind: output, shape index: {}]  }
   0x1   :  { %v4_v0 = vld [vmem:[%s22_s0] ss:$0 sm:$0xff] }
   0x2   :  { %5 = vst [vmem:[%s23_s1] sm:$0xf] %v4_v0 }

// kernel: tile.0
= control target key start
LH: loop header
LB: loop body
LE: loop exit
PB: predicated region body
PF: predicated region fallthrough
CT: control target
= control target key end

     0   :  { %s66_s8 = smov 125   ;;  %s67_s9 = smov 123   ;;  %vm7_vm0 = vcmask 7168   ;;  %s117_s0 = inlined_call_operand.vmem [shape: f32[4,8], index: 0, kind: input, shape index: {}]   ;;  %s118_s1 = inlined_call_operand.vmem [shape: f32[32,1], index: 1, kind: output, shape index: {}]  }
   0x1   :  { %v4_v0 = vld [vmem:[%s117_s0] sm:$0xf]  ;;  %s65_s0 = smov 127   ;;  %s68_s10 = smov 126  }
   0x2   :  { %5 = vst [vmem:[#allocation0] sm:$0xf] %v4_v0  ;;  %s69_s11 = smov 124   ;;  %s70_s12 = smov 122  }
   0x3   :  { %s71_s13 = smov 121  }
   0x9   :  { %v9_v1 = vld [vmem:[#allocation0] sm:$0xf]  }
   0xa   :  { %v21_v2 = vld [vmem:[#allocation0] sm:$0xf]   ;;  %10 = vrot.lane.b32.xlu0 %v9_v1, %s65_s0 }
   0xb   :  { %22 = vrot.lane.b32.xlu1 %v21_v2, %s66_s8  ;;  %v33_v3 = vld [vmem:[#allocation0] sm:$0xf]  }
   0xc   :  { %34 = vrot.lane.b32.xlu2 %v33_v3, %s67_s9  ;;  %v15_v4 = vld [vmem:[#allocation0] sm:$0xf]  }
   0xd   :  { %v27_v5 = vld [vmem:[#allocation0] sm:$0xf]  }
   0xe   :  { %v39_v6 = vld [vmem:[#allocation0] sm:$0xf]  }
   0xf   :  { %v45_v7 = vld [vmem:[#allocation0] sm:$0xf]  }
  0x10   :  { %v6_v8 = vld [vmem:[#allocation0] sm:$0xf]  }
  0x11   :  { %8 = vst.msk [vmem:[%s118_s1] ss:$8 sm:$0xf] %vm7_vm0, %v6_v8  }
  0x12   :  { %16 = vrot.lane.b32.xlu0 %v15_v4, %s68_s10 }
  0x13   :  { %28 = vrot.lane.b32.xlu1 %v27_v5, %s69_s11 }
  0x14   :  { %40 = vrot.lane.b32.xlu2 %v39_v6, %s70_s12 }
  0x1a   :  { %46 = vrot.lane.b32.xlu0 %v45_v7, %s71_s13 }
  0x66   :  { %v35_v9 = vpop.permute.xlu2 %34  }
  0x67   :  { %55 = vst.msk [vmem:[%s118_s1 + $0x5] ss:$8 sm:$0xf] %vm7_vm0, %v35_v9  }
  0x6e   :  { %v41_v10 = vpop.permute.xlu2 %40  }
  0x6f   :  { %56 = vst.msk [vmem:[%s118_s1 + $0x6] ss:$8 sm:$0xf] %vm7_vm0, %v41_v10  }
  0x7c   :  { %v11_v11 = vpop.permute.xlu0 %10  }
  0x7d   :  { %v23_v12 = vpop.permute.xlu1 %22   ;;  %51 = vst.msk [vmem:[%s118_s1 + $0x1] ss:$8 sm:$0xf] %vm7_vm0, %v11_v11  }
  0x7e   :  { %53 = vst.msk [vmem:[%s118_s1 + $0x3] ss:$8 sm:$0xf] %vm7_vm0, %v23_v12  }
  0x84   :  { %v17_v13 = vpop.permute.xlu0 %16  }
  0x85   :  { %v29_v14 = vpop.permute.xlu1 %28   ;;  %52 = vst.msk [vmem:[%s118_s1 + $0x2] ss:$8 sm:$0xf] %vm7_vm0, %v17_v13  }
  0x86   :  { %54 = vst.msk [vmem:[%s118_s1 + $0x4] ss:$8 sm:$0xf] %vm7_vm0, %v29_v14  }
  0x8c   :  { %v47_v15 = vpop.permute.xlu0 %46  }
  0x8d   :  { %57 = vst.msk [vmem:[%s118_s1 + $0x7] ss:$8 sm:$0xf] %vm7_vm0, %v47_v15  }

// kernel: up_conv_forward.2
= control target key start
LH: loop header
LB: loop body
LE: loop exit
PB: predicated region body
PF: predicated region fallthrough
CT: control target
= control target key end

     0   :  { %s357_s12 = smov 0   ;;  %s398_s0 = inlined_call_operand.vmem [shape: f32[2,8,64], index: 0, kind: input, shape index: {}]   ;;  %s399_s1 = inlined_call_operand.vmem [shape: f32[32,8], index: 1, kind: input, shape index: {}]   ;;  %s400_s2 = inlined_call_operand.vmem [shape: f32[32,1], index: 2, kind: input, shape index: {}]   ;;  %s401_s3 = inlined_call_operand.vmem [shape: f32[2,32,64], index: 3, kind: output, shape index: {}]  }
   0x1 LB: > { %s299_s13 = sadd.s32 4294967295, %s334_s12   ;;  %p303_p0 = scmp.ge.s32.totalorder %s334_s12, 1  ;;  %s334_s12 = sphi %s357_s12, %s13_s12  }
   0x2   : > { %p136_p1 = scmp.lt.s32.totalorder %s334_s12, 3 }
   0x4   : > { %p137_p2 = pnand %p303_p0, %p136_p1 }
   0x5   : > { %p159_p3 = scmp.lt.s32.totalorder (!%p137_p2), %s299_s13, 1 }
   0x6   : > { %140 = sbr.rel (%p137_p2) target bundleno = 154 (0x9a), region = 32 }
   0xb   : > { %v336_v0 = vmov 0   ;;  %v175_v1 = vld [vmem:[%s400_s2 + $0x10] sm:$0xff]  ;;  %v173_v2 = vld [vmem:[%s400_s2] sm:$0xff]  ;;  %s403_s13 = smov (!%p159_p3, %s299_s13), 1  ;;  %vm197_vm0 = vcmask 64512   ;;  %v169_v5 = vld [vmem:[%s399_s1 + $0x8] sm:$0xff] }
   0xc   : > { %327 = vset.pattern.permute.xlu1 %v336_v0  ;;  %326 = vset.pattern.permute.xlu0 %v336_v0  ;;  %s304_s18 = sshll.u32 %s403_s13, 3  ;;  %v168_v4 = vld [vmem:[%s399_s1] sm:$0xff]  ;;  %v170_v6 = vld [vmem:[%s399_s1 + $0x10] sm:$0xff]  ;;  %v171_v7 = vld [vmem:[%s399_s1 + $0x18] sm:$0xff]  ;;  %s313_s7 = sshll.u32 %s403_s13, 5  ;;  %vm239_vm1 = vcmask 523264  }
   0xd   : > { %189 = vperm.xlu1 %327, %v175_v1   ;;  %179 = vperm.xlu0 %326, %v173_v2   ;;  %s162_s21 = scalar_lea.vmem %s398_s0, %s304_s18  ;;  %v176_v8 = vld [vmem:[%s400_s2 + $0x18] sm:$0xff]  ;;  %v174_v9 = vld [vmem:[%s400_s2 + $0x8] sm:$0xff]  ;;  %s167_s10 = scalar_lea.vmem %s401_s3, %s313_s7 }
   0xe   : > { %v172_v3 = vld [vmem:[%s162_s21] sm:$0xff] }
   0xf   : > { %225 = vmatpush.msra.mxu0 %v172_v3  ;;  %314 = vmatpush.msra.mxu1 %v172_v3 }
  0x10   : > { %315 = vmatpush.msra.mxu2 %v172_v3  ;;  %316 = vmatpush.msra.mxu3 %v172_v3 }
  0x11   : > { %307 = vmatmul.msk.f32.vlgmr.msra.gmra.mxu0 %vm197_vm0, %v168_v4  ;;  %308 = vmatmul.msk.f32.vlgmr.msra.gmra.mxu1 %vm197_vm0, %v169_v5 }
  0x12   : > { %309 = vmatmul.msk.f32.vlgmr.msra.gmra.mxu2 %vm197_vm0, %v170_v6  ;;  %310 = vmatmul.msk.f32.vlgmr.msra.gmra.mxu3 %vm197_vm0, %v171_v7 }
  0x15   : > { %194 = vperm.xlu1 %327, %v176_v8   ;;  %184 = vperm.xlu0 %326, %v174_v9  }
  0x7f   : > { %v180_v10 = vpop.permute.xlu0 %179  ;;  %v190_v11 = vpop.permute.xlu1 %189 }
  0x87   : > { %v185_v12 = vpop.permute.xlu0 %184  ;;  %v195_v17 = vpop.permute.xlu1 %194 }
  0x8e   : > { %v227_v13 = vpop.f32.mrf.mxu0  ;;  %v230_v14 = vpop.f32.mrf.mxu1 }
  0x8f   : > { %v228_v15 = vadd.f32 %v227_v13, %v180_v10  ;;  %v231_v16 = vadd.f32 %v230_v14, %v185_v12 }
  0x91   : > { %240 = vst.msk [vmem:[%s167_s10] sm:$0xff] %vm239_vm1, %v228_v15 }
  0x92   : > { %241 = vst.msk [vmem:[%s167_s10 + $0x8] sm:$0xff] %vm239_vm1, %v231_v16 }
  0x95   : > { %v233_v18 = vpop.f32.mrf.mxu2  ;;  %v236_v19 = vpop.f32.mrf.mxu3 }
  0x96   : > { %v234_v20 = vadd.f32 %v233_v18, %v190_v11  ;;  %v237_v21 = vadd.f32 %v236_v19, %v195_v17 }
  0x98   : > { %242 = vst.msk [vmem:[%s167_s10 + $0x10] sm:$0xff] %vm239_vm1, %v234_v20 }
  0x99   : > { %243 = vst.msk [vmem:[%s167_s10 + $0x18] sm:$0xff] %vm239_vm1, %v237_v21 }
  0x9a PF: > { %s13_s12 = sadd.s32 1, %s334_s12  }
  0x9b   : > { %p10_p4 = scmp.ge.s32.totalorder %s13_s12, 4  }
  0x9d   :  { %12 = sbr.rel (!%p10_p4) target bundleno = 1 (0x1), region = 62 }

// kernel: up_conv_forward.3
= control target key start
LH: loop header
LB: loop body
LE: loop exit
PB: predicated region body
PF: predicated region fallthrough
CT: control target
= control target key end

     0   :  { %s2321_s27 = smov 0   ;;  %s2620_s0 = inlined_call_operand.vmem [shape: f32[2,8,342], index: 0, kind: input, shape index: {}]   ;;  %s2621_s1 = inlined_call_operand.vmem [shape: f32[9,4,8], index: 1, kind: input, shape index: {}]   ;;  %s2622_s2 = inlined_call_operand.vmem [shape: f32[4,1], index: 2, kind: input, shape index: {}]   ;;  %s2623_s3 = inlined_call_operand.vmem [shape: f32[9,4,4], index: 3, kind: input, shape index: {}]   ;;  %s2624_s4 = inlined_call_operand.vmem [shape: f32[4,1], index: 4, kind: input, shape index: {}]   ;;  %s2625_s5 = inlined_call_operand.vmem [shape: f32[2,4,1], index: 5, kind: input, shape index: {}]   ;;  %s2626_s6 = inlined_call_operand.vmem [shape: f32[2,4,1], index: 6, kind: input, shape index: {}]   ;;  %s2627_s7 = inlined_call_operand.vmem [shape: f32[1,288], index: 7, kind: input, shape index: {}]   ;;  %s2628_s8 = inlined_call_operand.vmem [shape: f32[2,4,288], index: 8, kind: output, shape index: {}]  }
   0x1 LB: > { %s2082_s28 = sadd.s32 4294967295, %s2263_s27   ;;  %p2086_p0 = scmp.ge.s32.totalorder %s2263_s27, 1  ;;  %s2263_s27 = sphi %s2321_s27, %s18_s27  }
   0x2   : > { %p280_p1 = scmp.lt.s32.totalorder %s2263_s27, 3 }
   0x4   : > { %p281_p2 = pnand %p2086_p0, %p280_p1 }
   0x5   : > { %p322_p3 = scmp.lt.s32.totalorder (!%p281_p2), %s2082_s28, 1  ;;  %s2265_s11 = smov (!%p281_p2), 127  }
   0x6   : > { %284 = sbr.rel (%p281_p2) target bundleno = 1356 (0x54c), region = 52  ;;  %s2266_s12 = smov (!%p281_p2), 126  }
   0x7   : > { %s2267_s13 = smov (!%p281_p2), 110   ;;  %s2268_s14 = smov (!%p281_p2), 109  }
   0x8   : > { %s2269_s15 = smov (!%p281_p2), 108   ;;  %s2270_s16 = smov (!%p281_p2), 92  }
   0x9   : > { %s2271_s17 = smov (!%p281_p2), 91   ;;  %s2272_s18 = smov (!%p281_p2), 90  }
   0xa   : > { %s2275_s9 = smov (!%p281_p2), 19  }
   0xb   : > { %s2634_s28 = smov (!%p322_p3, %s2082_s28), 1  ;;  %vm363_vm0 = vcmask 64512   ;;  %v345_v6 = vld [vmem:[%s2621_s1] sm:$0xf]  ;;  %vm498_vm1 = vcmask 1031168   ;;  %vm578_vm2 = vcmask 900096  }
   0xc   : > { %s2190_s29 = smul.u32 24, %s2634_s28  ;;  %v2091_v16 = vld [vmem:[%s2621_s1 + $0x4] sm:$0xf]  ;;  %vm357_vm3 = vcmask 1039360   ;;  %v2098_v26 = vld [vmem:[%s2621_s1 + $0x8] sm:$0xf] }
   0xd   : > { %vm738_vm4 = vcmask 883712   ;;  %vm658_vm5 = vcmask 891904   ;;  %v2102_v33 = vld [vmem:[%s2621_s1 + $0xc] sm:$0xf]  ;;  %vm818_vm6 = vcmask 752640   ;;  %v2273_v50 = vmov 0  }
   0xe   : > { %s326_s10 = scalar_lea.vmem %s2620_s0, %s2190_s29  ;;  %v2106_v41 = vld [vmem:[%s2621_s1 + $0x10] sm:$0xf]  ;;  %v2110_v45 = vld [vmem:[%s2621_s1 + $0x14] sm:$0xf]  ;;  %v344_v48 = vld [vmem:[%s2622_s2] sm:$0xf]  ;;  %2251 = vset.pattern.permute.xlu1 %v2273_v50  ;;  %2252 = vset.pattern.permute.xlu0 %v2273_v50 }
   0xf   : > { %v340_v0 = vld [vmem:[%s326_s10] sm:$0xff]  ;;  %v2335_v1 = vld [vmem:[%s326_s10 + $0x10] sm:$0xff]  ;;  %v2337_v2 = vld [vmem:[%s326_s10 + $0x8] sm:$0xff]  ;;  %vm898_vm7 = vcmask 744448   ;;  %vm978_vm8 = vcmask 736256   ;;  %vm1068_vm9 = vcmask 1043456  }
  0x10   : > { %v2211_v3 = vpack.i.bf16 %v340_v0, %v2335_v1  ;;  %v2216_v4 = vpack.i.bf16 %v2337_v2, %v340_v0  ;;  %445 = vmatpush.msra.mxu3 %v340_v0  ;;  %v2221_v5 = vpack.i.bf16 %v2335_v1, %v2337_v2  ;;  %v2114_v53 = vld [vmem:[%s2621_s1 + $0x18] sm:$0xf]  ;;  %v2118_v61 = vld [vmem:[%s2621_s1 + $0x1c] sm:$0xf]  ;;  %vm2629_vm10 = vcmask 257024   ;;  %s2088_s22 = sshll.u32 %s2634_s28, 2 }
  0x11   : > { %2095 = vmatmul.msk.f32.vlgmr.msra.gmra.mxu3 %vm363_vm0, %v345_v6  ;;  %vm1113_vm14 = vcmask 699392   ;;  %vm1130_vm15 = vcmask 1043608   ;;  %s334_s25 = scalar_lea.vmem %s2626_s6, %s2088_s22 }
  0x12   : > { %2212 = vrot.lane.b32.xlu0 %v2211_v3, %s2265_s11  ;;  %2217 = vrot.lane.b32.xlu1 %v2216_v4, %s2266_s12 }
  0x13   : > { %2222 = vrot.lane.b32.xlu2 %v2221_v5, %s2267_s13 }
  0x1a   : > { %353 = vrot.lane.b32.xlu0 %v2337_v2, %s2265_s11  ;;  %496 = vrot.lane.b32.xlu1 %v2335_v1, %s2266_s12 }
  0x1b   : > { %572 = vrot.lane.b32.xlu2 %v340_v0, %s2267_s13 }
  0x22   : > { %2227 = vrot.lane.b32.xlu0 %v2211_v3, %s2268_s14  ;;  %654 = vrot.lane.b32.xlu1 %v2337_v2, %s2268_s14 }
  0x23   : > { %2232 = vrot.lane.b32.xlu2 %v2216_v4, %s2269_s15 }
  0x2a   : > { %2237 = vrot.lane.b32.xlu0 %v2216_v4, %s2270_s16  ;;  %736 = vrot.lane.b32.xlu1 %v2335_v1, %s2269_s15 }
  0x2b   : > { %816 = vrot.lane.b32.xlu2 %v2335_v1, %s2270_s16 }
  0x32   : > { %2242 = vrot.lane.b32.xlu0 %v2221_v5, %s2271_s17  ;;  %892 = vrot.lane.b32.xlu1 %v340_v0, %s2271_s17  ;;  %v2122_v0 = vld [vmem:[%s2621_s1 + $0x20] sm:$0xf] }
  0x33   : > { %2247 = vrot.lane.b32.xlu2 %v2211_v3, %s2272_s18 }
  0x3a   : > { %974 = vrot.lane.b32.xlu0 %v2337_v2, %s2272_s18  ;;  %1052 = vperm.xlu1 %2251, %v344_v48  }
  0x6d   : > { %v2223_v7 = vpop.permute.xlu2 %2222 }
  0x6e   : > { %v2225_v9 = vunpack.i.h.bf16 %v2223_v7  ;;  %v2224_v10 = vunpack.i.l.bf16 %v2223_v7 }
  0x70   : > { %v580_v18 = vsel %vm578_vm2, %v2224_v10, %v2225_v9 }
  0x75   : > { %v573_v8 = vpop.permute.xlu2 %572 }
  0x76   : > { %v579_v29 = vsel %vm578_vm2, %v573_v8, %v2224_v10 }
  0x7d   : > { %v2233_v19 = vpop.permute.xlu2 %2232 }
  0x7e   : > { %v2235_v23 = vunpack.i.h.bf16 %v2233_v19  ;;  %v2234_v28 = vunpack.i.l.bf16 %v2233_v19 }
  0x80   : > { %v739_v30 = vsel %vm738_vm4, %v2234_v28, %v2235_v23 }
  0x84   : > { %v2213_v11 = vpop.permute.xlu0 %2212  ;;  %v2218_v12 = vpop.permute.xlu1 %2217 }
  0x85   : > { %v2214_v13 = vunpack.i.l.bf16 %v2213_v11  ;;  %v2220_v14 = vunpack.i.h.bf16 %v2218_v12  ;;  %v2219_v15 = vunpack.i.l.bf16 %v2218_v12  ;;  %v2215_v20 = vunpack.i.h.bf16 %v2213_v11  ;;  %v817_v38 = vpop.permute.xlu2 %816 }
  0x87   : > { %422 = vmatpush.msra.mxu2 %v2214_v13  ;;  %v499_v17 = vsel %vm498_vm1, %v2219_v15, %v2220_v14 }
  0x88   : > { %2094 = vmatmul.msk.f32.vlgmr.msra.gmra.mxu2 %vm363_vm0, %v2091_v16 }
  0x89   : > { %522 = vmatpush.msrb.mxu2 %v499_v17 }
  0x8b   : > { %622 = vmatpush.msra.mxu2 %v580_v18 }
  0x8c   : > { %v354_v21 = vpop.permute.xlu0 %353  ;;  %v497_v22 = vpop.permute.xlu1 %496 }
  0x8d   : > { %v358_v24 = vsel %vm357_vm3, %v2215_v20, %v354_v21  ;;  %v359_v25 = vsel %vm357_vm3, %v354_v21, %v2214_v13  ;;  %v500_v27 = vsel %vm498_vm1, %v2220_v14, %v497_v22  ;;  %v2248_v49 = vpop.permute.xlu2 %2247 }
  0x8e   : > { %382 = vmatpush.msra.mxu0 %v358_v24  ;;  %402 = vmatpush.msra.mxu1 %v359_v25  ;;  %v2249_v58 = vunpack.i.l.bf16 %v2248_v49  ;;  %v2250_v59 = vunpack.i.h.bf16 %v2248_v49 }
  0x8f   : > { %2092 = vmatmul.msk.f32.vlgmr.msra.gmra.mxu0 %vm363_vm0, %v2091_v16  ;;  %2093 = vmatmul.msk.f32.vlgmr.msra.gmra.mxu1 %vm363_vm0, %v2091_v16 }
  0x90   : > { %2099 = vmatmul.msk.f32.vlgmr.msrb.gmra.mxu2 %vm363_vm0, %v2098_v26  ;;  %542 = vmatpush.msrb.mxu3 %v500_v27 }
  0x91   : > { %2100 = vmatmul.msk.f32.vlgmr.msrb.gmra.mxu3 %vm363_vm0, %v2098_v26  ;;  %465 = vmatpush.msrb.mxu0 %v2337_v2 }
  0x92   : > { %485 = vmatpush.msrb.mxu1 %v2335_v1  ;;  %642 = vmatpush.msra.mxu3 %v2225_v9 }
  0x93   : > { %562 = vmatpush.msra.mxu0 %v497_v22 }
  0x94   : > { %602 = vmatpush.msra.mxu1 %v579_v29  ;;  %v2228_v31 = vpop.permute.xlu0 %2227  ;;  %v655_v32 = vpop.permute.xlu1 %654  ;;  %762 = vmatpush.msrb.mxu3 %v739_v30 }
  0x95   : > { %v2230_v34 = vunpack.i.h.bf16 %v2228_v31  ;;  %v2229_v35 = vunpack.i.l.bf16 %v2228_v31  ;;  %v447_v4 = vpop.f32.mrf.mxu3 }
  0x97   : > { %2096 = vmatmul.msk.f32.vlgmr.msrb.gmra.mxu0 %vm363_vm0, %v345_v6  ;;  %2097 = vmatmul.msk.f32.vlgmr.msrb.gmra.mxu1 %vm363_vm0, %v345_v6  ;;  %v659_v36 = vsel %vm658_vm5, %v2230_v34, %v655_v32  ;;  %v660_v37 = vsel %vm658_vm5, %v655_v32, %v2229_v35 }
  0x98   : > { %2104 = vmatmul.msk.f32.vlgmr.msra.gmra.mxu2 %vm363_vm0, %v2102_v33  ;;  %682 = vmatpush.msrb.mxu0 %v659_v36 }
  0x99   : > { %2105 = vmatmul.msk.f32.vlgmr.msra.gmra.mxu3 %vm363_vm0, %v2102_v33  ;;  %722 = vmatpush.msrb.mxu2 %v2229_v35 }
  0x9a   : > { %702 = vmatpush.msrb.mxu1 %v660_v37 }
  0x9c   : > { %v2238_v39 = vpop.permute.xlu0 %2237  ;;  %v737_v40 = vpop.permute.xlu1 %736 }
  0x9d   : > { %v2240_v42 = vunpack.i.h.bf16 %v2238_v39  ;;  %v2239_v43 = vunpack.i.l.bf16 %v2238_v39  ;;  %v740_v44 = vsel %vm738_vm4, %v2235_v23, %v737_v40 }
  0x9f   : > { %2101 = vmatmul.msk.f32.vlgmr.msra.gmra.mxu0 %vm363_vm0, %v2098_v26  ;;  %2103 = vmatmul.msk.f32.vlgmr.msra.gmra.mxu1 %vm363_vm0, %v2102_v33  ;;  %v819_v46 = vsel %vm818_vm6, %v2239_v43, %v2240_v42  ;;  %v820_v47 = vsel %vm818_vm6, %v2240_v42, %v817_v38  ;;  %v343_v43 = vld [vmem:[%s2627_s7] sm:$0x7] }
  0xa0   : > { %2109 = vmatmul.msk.f32.vlgmr.msrb.gmra.mxu2 %vm363_vm0, %v2106_v41  ;;  %782 = vmatpush.msra.mxu0 %v740_v44 }
  0xa1   : > { %2111 = vmatmul.msk.f32.vlgmr.msrb.gmra.mxu3 %vm363_vm0, %v2110_v45  ;;  %842 = vmatpush.msra.mxu2 %v819_v46 }
  0xa2   : > { %862 = vmatpush.msra.mxu3 %v820_v47  ;;  %802 = vmatpush.msra.mxu1 %v737_v40 }
  0xa4   : > { %v2243_v51 = vpop.permute.xlu0 %2242  ;;  %v893_v52 = vpop.permute.xlu1 %892 }
  0xa5   : > { %v2245_v54 = vunpack.i.h.bf16 %v2243_v51  ;;  %v2244_v55 = vunpack.i.l.bf16 %v2243_v51 }
  0xa7   : > { %2107 = vmatmul.msk.f32.vlgmr.msrb.gmra.mxu0 %vm363_vm0, %v2106_v41  ;;  %2108 = vmatmul.msk.f32.vlgmr.msrb.gmra.mxu1 %vm363_vm0, %v2106_v41  ;;  %v900_v56 = vsel %vm898_vm7, %v2244_v55, %v2245_v54  ;;  %v899_v57 = vsel %vm898_vm7, %v893_v52, %v2244_v55  ;;  %v2443_v52 = vperm.slane %v343_v43, 0  ;;  %v2445_v55 = vperm.slane %v343_v43, 1 }
  0xa8   : > { %2115 = vmatmul.msk.f32.vlgmr.msra.gmra.mxu2 %vm363_vm0, %v2114_v53  ;;  %882 = vmatpush.msrb.mxu0 %v817_v38 }
  0xa9   : > { %2116 = vmatmul.msk.f32.vlgmr.msra.gmra.mxu3 %vm363_vm0, %v2114_v53  ;;  %942 = vmatpush.msrb.mxu2 %v900_v56  ;;  %v2447_v56 = vperm.slane %v343_v43, 2 }
  0xaa   : > { %962 = vmatpush.msrb.mxu3 %v2245_v54  ;;  %922 = vmatpush.msrb.mxu1 %v899_v57 }
  0xab   : > { %1042 = vmatpush.msra.mxu2 %v2249_v58 }
  0xac   : > { %v975_v60 = vpop.permute.xlu0 %974  ;;  %v1053_v48 = vpop.permute.xlu1 %1052 }
  0xad   : > { %v979_v62 = vsel %vm978_vm8, %v2250_v59, %v975_v60  ;;  %v980_v63 = vsel %vm978_vm8, %v975_v60, %v2249_v58 }
  0xaf   : > { %2112 = vmatmul.msk.f32.vlgmr.msra.gmra.mxu0 %vm363_vm0, %v2110_v45  ;;  %2113 = vmatmul.msk.f32.vlgmr.msra.gmra.mxu1 %vm363_vm0, %v2110_v45 }
  0xb0   : > { %2120 = vmatmul.msk.f32.vlgmr.msrb.gmra.mxu2 %vm363_vm0, %v2118_v61  ;;  %1002 = vmatpush.msra.mxu0 %v979_v62 }
  0xb1   : > { %2121 = vmatmul.msk.f32.vlgmr.msrb.gmra.mxu3 %vm363_vm0, %v2118_v61  ;;  %1022 = vmatpush.msra.mxu1 %v980_v63 }
  0xb7   : > { %2117 = vmatmul.msk.f32.vlgmr.msrb.gmra.mxu0 %vm363_vm0, %v2114_v53  ;;  %2119 = vmatmul.msk.f32.vlgmr.msrb.gmra.mxu1 %vm363_vm0, %v2118_v61 }
  0xb8   : > { %2125 = vmatmul.msk.f32.vlgmr.msra.gmra.mxu2 %vm363_vm0, %v2122_v0 }
  0xbf   : > { %2123 = vmatmul.msk.f32.vlgmr.msra.gmra.mxu0 %vm363_vm0, %v2122_v0  ;;  %2124 = vmatmul.msk.f32.vlgmr.msra.gmra.mxu1 %vm363_vm0, %v2122_v0  ;;  %vm1131_vm0 = vcmask 1047556  }
 0x10b   : > { %v424_v1 = vpop.f32.mrf.mxu2 }
 0x10c   : > { %v384_v2 = vpop.f32.mrf.mxu0  ;;  %v404_v3 = vpop.f32.mrf.mxu1 }
 0x10d   : > { %v448_v23 = vadd.f32 %v447_v4, %v384_v2 }
 0x113   : > { %v524_v5 = vpop.f32.mrf.mxu2 }
 0x114   : > { %v467_v6 = vpop.f32.mrf.mxu0  ;;  %v487_v7 = vpop.f32.mrf.mxu1  ;;  %v567_v25 = vadd.f32 %v524_v5, %v448_v23  ;;  %v2274_v23 = vmov 0.0  }
 0x115   : > { %v544_v8 = vpop.f32.mrf.mxu3  ;;  %v488_v17 = vadd.f32 %v487_v7, %v424_v1  ;;  %v468_v18 = vadd.f32 %v467_v6, %v404_v3  ;;  %1112 = vst [vmem:[#allocation2] sm:$0xff] %v2274_v23 }
 0x116   : > { %1114 = vst.msk [vmem:[#allocation2 + $0x8] sm:$0xf] %vm1113_vm14, %v2274_v23 }
 0x117   : > { %v568_v26 = vadd.f32 %v544_v8, %v468_v18 }
 0x11b   : > { %v624_v9 = vpop.f32.mrf.mxu2 }
 0x11c   : > { %v564_v10 = vpop.f32.mrf.mxu0  ;;  %v604_v11 = vpop.f32.mrf.mxu1  ;;  %v648_v28 = vadd.f32 %v624_v9, %v568_v26 }
 0x11d   : > { %v644_v12 = vpop.f32.mrf.mxu3  ;;  %v569_v20 = vadd.f32 %v564_v10, %v488_v17  ;;  %v647_v29 = vadd.f32 %v604_v11, %v567_v25 }
 0x11f   : > { %v649_v27 = vadd.f32 %v644_v12, %v569_v20 }
 0x123   : > { %v724_v13 = vpop.f32.mrf.mxu2 }
 0x124   : > { %v684_v14 = vpop.f32.mrf.mxu0  ;;  %v704_v15 = vpop.f32.mrf.mxu1  ;;  %v729_v30 = vadd.f32 %v724_v13, %v649_v27 }
 0x125   : > { %v764_v16 = vpop.f32.mrf.mxu3  ;;  %v727_v31 = vadd.f32 %v684_v14, %v647_v29  ;;  %v728_v32 = vadd.f32 %v704_v15, %v648_v28 }
 0x127   : > { %v807_v39 = vadd.f32 %v764_v16, %v727_v31 }
 0x12b   : > { %v844_v19 = vpop.f32.mrf.mxu2 }
 0x12c   : > { %v784_v21 = vpop.f32.mrf.mxu0  ;;  %v804_v22 = vpop.f32.mrf.mxu1  ;;  %v887_v41 = vadd.f32 %v844_v19, %v807_v39 }
 0x12d   : > { %v864_v24 = vpop.f32.mrf.mxu3  ;;  %v809_v34 = vadd.f32 %v804_v22, %v729_v30  ;;  %v808_v37 = vadd.f32 %v784_v21, %v728_v32 }
 0x12f   : > { %v888_v42 = vadd.f32 %v864_v24, %v808_v37 }
 0x133   : > { %v944_v33 = vpop.f32.mrf.mxu2 }
 0x134   : > { %v884_v35 = vpop.f32.mrf.mxu0  ;;  %v924_v36 = vpop.f32.mrf.mxu1  ;;  %v968_v45 = vadd.f32 %v944_v33, %v888_v42 }
 0x135   : > { %v889_v38 = vadd.f32 %v884_v35, %v809_v34  ;;  %v964_v40 = vpop.f32.mrf.mxu3  ;;  %v967_v46 = vadd.f32 %v924_v36, %v887_v41 }
 0x137   : > { %v969_v44 = vadd.f32 %v964_v40, %v889_v38 }
 0x13b   : > { %v1044_v47 = vpop.f32.mrf.mxu2 }
 0x13c   : > { %v1049_v49 = vadd.f32 %v1044_v47, %v969_v44  ;;  %v1004_v50 = vpop.f32.mrf.mxu0  ;;  %v1024_v51 = vpop.f32.mrf.mxu1 }
 0x13d   : > { %v1047_v53 = vadd.f32 %v1004_v50, %v967_v46  ;;  %v1048_v54 = vadd.f32 %v1024_v51, %v968_v45 }
 0x13e   : > { %v1057_v57 = vadd.f32 %v1053_v48, %v1049_v49 }
 0x13f   : > { %v1055_v58 = vadd.f32 %v1053_v48, %v1047_v53  ;;  %v1056_v59 = vadd.f32 %v1053_v48, %v1048_v54 }
 0x140   : > { %v1067_v62 = vmul.f32 %v2447_v56, %v1057_v57 }
 0x141   : > { %v1065_v60 = vmul.f32 %v2443_v52, %v1055_v58  ;;  %v1066_v61 = vmul.f32 %v2445_v55, %v1056_v59 }
 0x142   : > { %v1073_v2 = vsel %vm2629_vm10, %v1067_v62, 0.0 }
 0x143   : > { %v1069_v63 = vsel %vm1068_vm9, %v1065_v60, 0.0  ;;  %v1070_v0 = vsel %vm1068_vm9, %v1066_v61, 0.0 }
 0x144   : > { %v1071_v1 = vadd.f32 %v1070_v0, %v1069_v63 }
 0x146   : > { %v1074_v3 = vadd.f32 %v1073_v2, %v1071_v1 }
 0x148   : > { %1075 = vadd.xlane.f32.xlu2 %v1074_v3 }
 0x1bb   : > { %v1076_v4 = vpop.xlane.xlu2 %1075 }
 0x1bc   : > { %v1077_v5 = vmul.f32 0.00390625, %v1076_v4 }
 0x1be   : > { %v1078_v6 = vsub.f32 %v1055_v58, %v1077_v5  ;;  %v1079_v7 = vsub.f32 %v1056_v59, %v1077_v5  ;;  %v1080_v8 = vsub.f32 %v1057_v57, %v1077_v5 }
 0x1c0   : > { %v1081_v9 = vmul.f32 %v1078_v6, %v2443_v52  ;;  %v1082_v10 = vmul.f32 %v1079_v7, %v2445_v55  ;;  %v1083_v11 = vmul.f32 %v1080_v8, %v2447_v56 }
 0x1c2   : > { %v1084_v12 = vmul.f32 %v1081_v9, %v1081_v9  ;;  %v1085_v13 = vmul.f32 %v1082_v10, %v1082_v10  ;;  %v1086_v14 = vmul.f32 %v1083_v11, %v1083_v11 }
 0x1c4   : > { %v1087_v15 = vsel %vm1068_vm9, %v1084_v12, 0.0  ;;  %v1088_v16 = vsel %vm1068_vm9, %v1085_v13, 0.0  ;;  %v1090_v18 = vsel %vm2629_vm10, %v1086_v14, 0.0  ;;  %vm1125_vm10 = vcmask 154624   ;;  %v1139_v12 = vld [vmem:[%s2623_s3] sm:$0xf] }
 0x1c5   : > { %v1089_v17 = vadd.f32 %v1088_v16, %v1087_v15  ;;  %v2126_v16 = vld [vmem:[%s2623_s3 + $0x4] sm:$0xf] }
 0x1c7   : > { %v1091_v19 = vadd.f32 %v1090_v18, %v1089_v17 }
 0x1c9   : > { %1092 = vadd.xlane.f32.xlu0 %v1091_v19 }
 0x23c   : > { %v1093_v20 = vpop.xlane.xlu0 %1092 }
 0x23d   : > { %v1094_v21 = vmul.f32 0.00390625, %v1093_v20 }
 0x23f   : > { %v1095_v22 = vadd.f32 1e-05, %v1094_v21 }
 0x241   : > { %2253 = vrsqrt.f32 %v1095_v22  ;;  %vm1102_vm12 = vweird.f32 %v1095_v22 }
 0x247   : > { %v2254_v24 = vpop.eup %2253 }
 0x248   : > { %v1097_v25 = vmul.f32 %v2254_v24, %v1095_v22  ;;  %vm1103_vm11 = vweird.f32 %v2254_v24 }
 0x249   : > { %vm1104_vm13 = vmor %vm1102_vm12, %vm1103_vm11  ;;  %vm1134_vm12 = vcmask 412672  }
 0x24a   : > { %v1098_v26 = vmul.f32 %v2254_v24, %v1097_v25  ;;  %vm1132_vm11 = vmor %vm1131_vm0, %vm1130_vm15  ;;  %v2139_v25 = vld [vmem:[%s2623_s3 + $0x8] sm:$0xf] }
 0x24c   : > { %v1099_v27 = vmul.f32 0.5, %v1098_v26 }
 0x24e   : > { %v1100_v28 = vsub.f32 1.5, %v1099_v27  ;;  %v2146_v27 = vld [vmem:[%s2623_s3 + $0xc] sm:$0xf] }
 0x250   : > { %v1101_v29 = vmul.f32 %v2254_v24, %v1100_v28 }
 0x252   : > { %v1105_v30 = vsel %vm1104_vm13, %v2254_v24, %v1101_v29 }
 0x253   : > { %v1106_v31 = vmul.f32 %v1105_v30, %v1081_v9  ;;  %v1107_v32 = vmul.f32 %v1105_v30, %v1082_v10  ;;  %v1108_v37 = vmul.f32 %v1105_v30, %v1083_v11 }
 0x255   : > { %v1110_v33 = vmax.f32 %v1107_v32, 0.0  ;;  %v1109_v34 = vmax.f32 %v1106_v31, 0.0  ;;  %v1111_v38 = vmax.f32 %v1108_v37, 0.0 }
 0x257   : > { %v1118_v35 = vrot.slane %v1110_v33, 4 }
 0x259   : > { %v1119_v36 = vsel %vm1068_vm9, %v1109_v34, %v1118_v35  ;;  %v2153_v35 = vld [vmem:[%s2623_s3 + $0x10] sm:$0xf] }
 0x25a   : > { %1120 = vrot.lane.b32.xlu1 %v1119_v36, %s2275_s9 }
 0x262   : > { %1122 = vrot.lane.b32.xlu1 %v1111_v38, %s2275_s9 }
 0x2cc   : > { %v1121_v39 = vpop.permute.xlu1 %1120 }
 0x2cd   : > { %v1124_v40 = vrot.slane %v1121_v39, 4 }
 0x2cf   : > { %v1126_v41 = vsel %vm1125_vm10, %v1124_v40, %v1121_v39  ;;  %v1138_v39 = vld [vmem:[%s2624_s4] sm:$0xf] }
 0x2d0   : > { %1133 = vst.msk [vmem:[#allocation2] sm:$0xff] %vm1132_vm11, %v1126_v41 }
 0x2d4   : > { %v1123_v42 = vpop.permute.xlu1 %1122 }
 0x2d5   : > { %v1127_v43 = vsel %vm1125_vm10, %v1124_v40, %v1123_v42  ;;  %vm1158_vm10 = vcmask 31744   ;;  %v2160_v42 = vld [vmem:[%s2623_s3 + $0x14] sm:$0xf] }
 0x2d6   : > { %1135 = vst.msk [vmem:[#allocation2 + $0x8] sm:$0xf] %vm1134_vm12, %v1127_v43 }
 0x2d7   : > { %v1136_v44 = vld [vmem:[#allocation2] sm:$0xff] }
 0x2d8   : > { %1144 = vst [vmem:[#allocation1] ss:$2 sm:$0xff] %v1136_v44 }
 0x2dd   : > { %v1137_v45 = vld [vmem:[#allocation2 + $0x8] sm:$0xf] }
 0x2de   : > { %1146 = vst [vmem:[#allocation1 + $0x10] ss:$2 sm:$0xff] %v1137_v45 }
 0x2df   : > { %v1147_v46 = vld.sshfl [vmem:[#allocation1] sm:$0xff pattern:$0x75316420]  ;;  %v1148_v47 = vld.sshfl [vmem:[#allocation1 + $0x8] sm:$0xff pattern:$0x75316420] }
 0x2e0   : > { %1150 = vrot.lane.b32.xlu1 %v1147_v46, %s2265_s11  ;;  %1228 = vst [vmem:[#allocation1] ss:$2 sm:$0xff] %v1136_v44 }
 0x2e5   : > { %v1149_v48 = vld.sshfl [vmem:[#allocation1 + $0x10] sm:$0xff pattern:$0x75316420] }
 0x2e6   : > { %1230 = vst [vmem:[#allocation1 + $0x10] ss:$2 sm:$0xff] %v1137_v45 }
 0x2e7   : > { %v1231_v49 = vld.sshfl [vmem:[#allocation1] sm:$0xff pattern:$0x75316420]  ;;  %v2463_v50 = vld.sshfl [vmem:[#allocation1 + $0x8] sm:$0xff pattern:$0x75316420] }
 0x2e8   : > { %1152 = vrot.lane.b32.xlu1 %v1148_v47, %s2265_s11  ;;  %2133 = vmatpush.msk.msrb.mxu2 %vm1068_vm9, %v1231_v49  ;;  %1305 = vst [vmem:[#allocation1] ss:$2 sm:$0xff] %v1136_v44 }
 0x2e9   : > { %2134 = vmatmul.msk.f32.vlgmr.msrb.gmra.mxu2 %vm1158_vm10, %v1139_v12 }
 0x2ed   : > { %v2467_v51 = vld.sshfl [vmem:[#allocation1 + $0x10] sm:$0xff pattern:$0x75316420] }
 0x2ee   : > { %1307 = vst [vmem:[#allocation1 + $0x10] ss:$2 sm:$0xff] %v1137_v45 }
 0x2ef   : > { %v1308_v53 = vld.sshfl [vmem:[#allocation1] sm:$0xff pattern:$0x75316420]  ;;  %v1309_v54 = vld.sshfl [vmem:[#allocation1 + $0x8] sm:$0xff pattern:$0x75316420] }
 0x2f0   : > { %1311 = vrot.lane.b32.xlu2 %v1308_v53, %s2266_s12  ;;  %1154 = vrot.lane.b32.xlu1 %v1149_v48, %s2265_s11  ;;  %1393 = vst [vmem:[#allocation1] ss:$2 sm:$0xff] %v1136_v44  ;;  %s330_s11 = scalar_lea.vmem %s2625_s5, %s2088_s22  ;;  %v2167_v48 = vld [vmem:[%s2623_s3 + $0x18] sm:$0xf] }
 0x2f1   : > { %v1978_v53 = vld [vmem:[%s330_s11] sm:$0xf] }
 0x2f5   : > { %v1310_v57 = vld.sshfl [vmem:[#allocation1 + $0x10] sm:$0xff pattern:$0x75316420] }
 0x2f6   : > { %1315 = vrot.lane.b32.xlu0 %v1310_v57, %s2266_s12  ;;  %1395 = vst [vmem:[#allocation1 + $0x10] ss:$2 sm:$0xff] %v1137_v45 }
 0x2f7   : > { %v1396_v58 = vld.sshfl [vmem:[#allocation1] sm:$0xff pattern:$0x75316420]  ;;  %v1397_v59 = vld.sshfl [vmem:[#allocation1 + $0x8] sm:$0xff pattern:$0x75316420] }
 0x2f8   : > { %1313 = vrot.lane.b32.xlu1 %v1309_v54, %s2266_s12  ;;  %1481 = vst [vmem:[#allocation1] ss:$2 sm:$0xff] %v1136_v44 }
 0x2fd   : > { %v1398_v60 = vld.sshfl [vmem:[#allocation1 + $0x10] sm:$0xff pattern:$0x75316420] }
 0x2fe   : > { %1403 = vrot.lane.b32.xlu2 %v1398_v60, %s2267_s13  ;;  %1483 = vst [vmem:[#allocation1 + $0x10] ss:$2 sm:$0xff] %v1137_v45 }
 0x2ff   : > { %v1485_v61 = vld.sshfl [vmem:[#allocation1 + $0x8] sm:$0xff pattern:$0x75316420]  ;;  %v1484_v62 = vld.sshfl [vmem:[#allocation1] sm:$0xff pattern:$0x75316420] }
 0x300   : > { %1399 = vrot.lane.b32.xlu1 %v1396_v58, %s2267_s13  ;;  %1487 = vrot.lane.b32.xlu0 %v1484_v62, %s2268_s14  ;;  %1569 = vst [vmem:[#allocation1] ss:$2 sm:$0xff] %v1136_v44  ;;  %v2174_v58 = vld [vmem:[%s2623_s3 + $0x1c] sm:$0xf] }
 0x305   : > { %v1486_v63 = vld.sshfl [vmem:[#allocation1 + $0x10] sm:$0xff pattern:$0x75316420] }
 0x306   : > { %1491 = vrot.lane.b32.xlu2 %v1486_v63, %s2268_s14  ;;  %1571 = vst [vmem:[#allocation1 + $0x10] ss:$2 sm:$0xff] %v1137_v45 }
 0x307   : > { %v1572_v0 = vld.sshfl [vmem:[#allocation1] sm:$0xff pattern:$0x75316420]  ;;  %v1573_v1 = vld.sshfl [vmem:[#allocation1 + $0x8] sm:$0xff pattern:$0x75316420] }
 0x308   : > { %1401 = vrot.lane.b32.xlu1 %v1397_v59, %s2267_s13  ;;  %1575 = vrot.lane.b32.xlu0 %v1572_v0, %s2269_s15  ;;  %1657 = vst [vmem:[#allocation1] ss:$2 sm:$0xff] %v1136_v44  ;;  %v2181_v0 = vld [vmem:[%s2623_s3 + $0x20] sm:$0xf] }
 0x30d   : > { %v1574_v2 = vld.sshfl [vmem:[#allocation1 + $0x10] sm:$0xff pattern:$0x75316420] }
 0x30e   : > { %1579 = vrot.lane.b32.xlu2 %v1574_v2, %s2269_s15  ;;  %1659 = vst [vmem:[#allocation1 + $0x10] ss:$2 sm:$0xff] %v1137_v45 }
 0x30f   : > { %v1660_v3 = vld.sshfl [vmem:[#allocation1] sm:$0xff pattern:$0x75316420]  ;;  %v1661_v4 = vld.sshfl [vmem:[#allocation1 + $0x8] sm:$0xff pattern:$0x75316420] }
 0x310   : > { %1489 = vrot.lane.b32.xlu1 %v1485_v61, %s2268_s14  ;;  %1745 = vst [vmem:[#allocation1] ss:$2 sm:$0xff] %v1136_v44  ;;  %1663 = vrot.lane.b32.xlu0 %v1660_v3, %s2270_s16 }
 0x315   : > { %v1662_v5 = vld.sshfl [vmem:[#allocation1 + $0x10] sm:$0xff pattern:$0x75316420] }
 0x316   : > { %1667 = vrot.lane.b32.xlu2 %v1662_v5, %s2270_s16  ;;  %1747 = vst [vmem:[#allocation1 + $0x10] ss:$2 sm:$0xff] %v1137_v45 }
 0x317   : > { %v1749_v6 = vld.sshfl [vmem:[#allocation1 + $0x8] sm:$0xff pattern:$0x75316420]  ;;  %v1748_v7 = vld.sshfl [vmem:[#allocation1] sm:$0xff pattern:$0x75316420] }
 0x318   : > { %1577 = vrot.lane.b32.xlu1 %v1573_v1, %s2269_s15  ;;  %1751 = vrot.lane.b32.xlu0 %v1748_v7, %s2271_s17  ;;  %1833 = vst [vmem:[#allocation1] ss:$2 sm:$0xff] %v1136_v44 }
 0x31d   : > { %v1750_v8 = vld.sshfl [vmem:[#allocation1 + $0x10] sm:$0xff pattern:$0x75316420] }
 0x31e   : > { %1755 = vrot.lane.b32.xlu2 %v1750_v8, %s2271_s17  ;;  %1835 = vst [vmem:[#allocation1 + $0x10] ss:$2 sm:$0xff] %v1137_v45  ;;  %v1969_v45 = vld [vmem:[%s334_s25] sm:$0xf] }
 0x31f   : > { %v1836_v9 = vld.sshfl [vmem:[#allocation1] sm:$0xff pattern:$0x75316420]  ;;  %v1837_v11 = vld.sshfl [vmem:[#allocation1 + $0x8] sm:$0xff pattern:$0x75316420] }
 0x320   : > { %1665 = vrot.lane.b32.xlu1 %v1661_v4, %s2270_s16  ;;  %1839 = vrot.lane.b32.xlu0 %v1836_v9, %s2272_s18 }
 0x325   : > { %v1838_v10 = vld.sshfl [vmem:[#allocation1 + $0x10] sm:$0xff pattern:$0x75316420] }
 0x326   : > { %1843 = vrot.lane.b32.xlu2 %v1838_v10, %s2272_s18 }
 0x328   : > { %1753 = vrot.lane.b32.xlu1 %v1749_v6, %s2271_s17  ;;  %1921 = vperm.xlu0 %2252, %v1138_v39  }
 0x330   : > { %1841 = vrot.lane.b32.xlu1 %v1837_v11, %s2272_s18  ;;  %1972 = vperm.xlu0 %2252, %v1969_v45   ;;  %s2191_s18 = smul.u32 12, %s2634_s28 }
 0x332   : > { %s339_s20 = scalar_lea.vmem %s2628_s8, %s2191_s18 }
 0x338   : > { %1981 = vperm.xlu0 %2252, %v1978_v53  }
 0x34a   : > { %v1312_v18 = vpop.permute.xlu2 %1311 }
 0x352   : > { %v1151_v13 = vpop.permute.xlu1 %1150 }
 0x358   : > { %v1404_v22 = vpop.permute.xlu2 %1403 }
 0x35a   : > { %v1153_v14 = vpop.permute.xlu1 %1152 }
 0x35b   : > { %v1156_v15 = vsel %vm357_vm3, %v1151_v13, %v1153_v14 }
 0x35c   : > { %2127 = vmatpush.msk.msra.mxu3 %vm1068_vm9, %v1156_v15 }
 0x35d   : > { %2128 = vmatmul.msk.f32.vlgmr.msra.gmra.mxu3 %vm1158_vm10, %v2126_v16 }
 0x35e   : > { %2135 = vmatpush.msk.msrb.mxu3 %vm1068_vm9, %v2463_v50 }
 0x360   : > { %v1492_v28 = vpop.permute.xlu2 %1491 }
 0x362   : > { %v1155_v17 = vpop.permute.xlu1 %1154 }
 0x363   : > { %v1157_v19 = vsel %vm357_vm3, %v1153_v14, %v1155_v17  ;;  %2131 = vmatpush.msk.msrb.mxu1 %vm1068_vm9, %v1155_v17 }
 0x364   : > { %2129 = vmatpush.msk.msrb.mxu0 %vm1068_vm9, %v1157_v19  ;;  %2132 = vmatmul.msk.f32.vlgmr.msrb.gmra.mxu1 %vm1158_vm10, %v2126_v16 }
 0x365   : > { %2130 = vmatmul.msk.f32.vlgmr.msrb.gmra.mxu0 %vm1158_vm10, %v2126_v16  ;;  %2136 = vmatmul.msk.f32.vlgmr.msrb.gmra.mxu3 %vm1158_vm10, %v1139_v12 }
 0x366   : > { %2137 = vmatpush.msk.msra.mxu0 %vm1068_vm9, %v2467_v51 }
 0x368   : > { %v1316_v20 = vpop.permute.xlu0 %1315  ;;  %v1580_v33 = vpop.permute.xlu2 %1579 }
 0x369   : > { %2144 = vmatpush.msk.msra.mxu3 %vm1068_vm9, %v1316_v20 }
 0x36a   : > { %v1314_v21 = vpop.permute.xlu1 %1313 }
 0x36b   : > { %v1317_v23 = vsel %vm498_vm1, %v1312_v18, %v1314_v21  ;;  %v1318_v24 = vsel %vm498_vm1, %v1314_v21, %v1316_v20  ;;  %vm2630_vm1 = vcmask 257024  }
 0x36c   : > { %2140 = vmatpush.msk.msra.mxu1 %vm1068_vm9, %v1317_v23  ;;  %2142 = vmatpush.msk.msra.mxu2 %vm1068_vm9, %v1318_v24  ;;  %v1260_v7 = vpop.f32.mrf.mxu2  ;;  %vm2632_vm13 = vmmov %vm2630_vm1 }
 0x36d   : > { %2141 = vmatmul.msk.f32.vlgmr.msra.gmra.mxu1 %vm1158_vm10, %v2139_v25  ;;  %2138 = vmatmul.msk.f32.vlgmr.msra.gmra.mxu0 %vm1158_vm10, %v1139_v12 }
 0x36e   : > { %2151 = vmatpush.msk.msrb.mxu2 %vm1068_vm9, %v1404_v22  ;;  %2145 = vmatmul.msk.f32.vlgmr.msra.gmra.mxu3 %vm1158_vm10, %v2139_v25 }
 0x36f   : > { %2143 = vmatmul.msk.f32.vlgmr.msra.gmra.mxu2 %vm1158_vm10, %v2139_v25 }
 0x370   : > { %v1668_v40 = vpop.permute.xlu2 %1667 }
 0x372   : > { %v1400_v26 = vpop.permute.xlu1 %1399  ;;  %v1488_v29 = vpop.permute.xlu0 %1487 }
 0x377   : > { %2152 = vmatmul.msk.f32.vlgmr.msrb.gmra.mxu2 %vm1158_vm10, %v2146_v27 }
 0x378   : > { %v1756_v49 = vpop.permute.xlu2 %1755 }
 0x37a   : > { %v1402_v30 = vpop.permute.xlu1 %1401  ;;  %v1576_v38 = vpop.permute.xlu0 %1575 }
 0x37b   : > { %v1405_v31 = vsel %vm578_vm2, %v1400_v26, %v1402_v30  ;;  %v1406_v32 = vsel %vm578_vm2, %v1402_v30, %v1404_v22  ;;  %vm2631_vm2 = vmmov %vm2630_vm1 }
 0x37c   : > { %2147 = vmatpush.msk.msrb.mxu0 %vm1068_vm9, %v1405_v31  ;;  %2149 = vmatpush.msk.msrb.mxu1 %vm1068_vm9, %v1406_v32 }
 0x37d   : > { %2148 = vmatmul.msk.f32.vlgmr.msrb.gmra.mxu0 %vm1158_vm10, %v2146_v27  ;;  %2150 = vmatmul.msk.f32.vlgmr.msrb.gmra.mxu1 %vm1158_vm10, %v2146_v27 }
 0x37e   : > { %2158 = vmatpush.msk.msra.mxu1 %vm1068_vm9, %v1492_v28 }
 0x380   : > { %v1844_v61 = vpop.permute.xlu2 %1843 }
 0x382   : > { %v1490_v34 = vpop.permute.xlu1 %1489  ;;  %v1664_v46 = vpop.permute.xlu0 %1663 }
 0x383   : > { %v1493_v36 = vsel %vm658_vm5, %v1488_v29, %v1490_v34  ;;  %v1494_v37 = vsel %vm658_vm5, %v1490_v34, %v1492_v28 }
 0x384   : > { %2154 = vmatpush.msk.msrb.mxu3 %vm1068_vm9, %v1493_v36  ;;  %2156 = vmatpush.msk.msra.mxu0 %vm1068_vm9, %v1494_v37 }
 0x385   : > { %2155 = vmatmul.msk.f32.vlgmr.msrb.gmra.mxu3 %vm1158_vm10, %v2153_v35  ;;  %2157 = vmatmul.msk.f32.vlgmr.msra.gmra.mxu0 %vm1158_vm10, %v2153_v35 }
 0x386   : > { %2165 = vmatpush.msk.msrb.mxu0 %vm1068_vm9, %v1580_v33  ;;  %2159 = vmatmul.msk.f32.vlgmr.msra.gmra.mxu1 %vm1158_vm10, %v2153_v35 }
 0x38a   : > { %v1578_v41 = vpop.permute.xlu1 %1577  ;;  %v1752_v54 = vpop.permute.xlu0 %1751 }
 0x38b   : > { %v1581_v43 = vsel %vm738_vm4, %v1576_v38, %v1578_v41  ;;  %v1582_v44 = vsel %vm738_vm4, %v1578_v41, %v1580_v33 }
 0x38c   : > { %2161 = vmatpush.msk.msra.mxu2 %vm1068_vm9, %v1581_v43  ;;  %2163 = vmatpush.msk.msra.mxu3 %vm1068_vm9, %v1582_v44 }
 0x38d   : > { %2162 = vmatmul.msk.f32.vlgmr.msra.gmra.mxu2 %vm1158_vm10, %v2160_v42  ;;  %2164 = vmatmul.msk.f32.vlgmr.msra.gmra.mxu3 %vm1158_vm10, %v2160_v42 }
 0x38e   : > { %2166 = vmatmul.msk.f32.vlgmr.msrb.gmra.mxu0 %vm1158_vm10, %v2160_v42  ;;  %2172 = vmatpush.msk.msrb.mxu3 %vm1068_vm9, %v1668_v40 }
 0x392   : > { %v1666_v47 = vpop.permute.xlu1 %1665  ;;  %v1840_v62 = vpop.permute.xlu0 %1839 }
 0x393   : > { %v1669_v50 = vsel %vm818_vm6, %v1664_v46, %v1666_v47  ;;  %v1670_v51 = vsel %vm818_vm6, %v1666_v47, %v1668_v40 }
 0x394   : > { %2168 = vmatpush.msk.msrb.mxu1 %vm1068_vm9, %v1669_v50  ;;  %2170 = vmatpush.msk.msrb.mxu2 %vm1068_vm9, %v1670_v51 }
 0x395   : > { %2169 = vmatmul.msk.f32.vlgmr.msrb.gmra.mxu1 %vm1158_vm10, %v2167_v48  ;;  %2171 = vmatmul.msk.f32.vlgmr.msrb.gmra.mxu2 %vm1158_vm10, %v2167_v48 }
 0x396   : > { %2173 = vmatmul.msk.f32.vlgmr.msrb.gmra.mxu3 %vm1158_vm10, %v2167_v48  ;;  %2179 = vmatpush.msk.msra.mxu2 %vm1068_vm9, %v1756_v49 }
 0x39a   : > { %v1754_v57 = vpop.permute.xlu1 %1753  ;;  %v1922_v51 = vpop.permute.xlu0 %1921 }
 0x39b   : > { %v1757_v59 = vsel %vm898_vm7, %v1752_v54, %v1754_v57  ;;  %v1758_v60 = vsel %vm898_vm7, %v1754_v57, %v1756_v49 }
 0x39c   : > { %2175 = vmatpush.msk.msra.mxu0 %vm1068_vm9, %v1757_v59  ;;  %2177 = vmatpush.msk.msra.mxu1 %vm1068_vm9, %v1758_v60 }
 0x39d   : > { %2176 = vmatmul.msk.f32.vlgmr.msra.gmra.mxu0 %vm1158_vm10, %v2174_v58  ;;  %2178 = vmatmul.msk.f32.vlgmr.msra.gmra.mxu1 %vm1158_vm10, %v2174_v58 }
 0x39e   : > { %2180 = vmatmul.msk.f32.vlgmr.msra.gmra.mxu2 %vm1158_vm10, %v2174_v58  ;;  %2186 = vmatpush.msk.msrb.mxu1 %vm1068_vm9, %v1844_v61 }
 0x3a2   : > { %v1842_v63 = vpop.permute.xlu1 %1841 }
 0x3a3   : > { %v1845_v1 = vsel %vm978_vm8, %v1840_v62, %v1842_v63  ;;  %v1846_v2 = vsel %vm978_vm8, %v1842_v63, %v1844_v61 }
 0x3a4   : > { %2182 = vmatpush.msk.msra.mxu3 %vm1068_vm9, %v1845_v1  ;;  %2184 = vmatpush.msk.msrb.mxu0 %vm1068_vm9, %v1846_v2 }
 0x3a5   : > { %2183 = vmatmul.msk.f32.vlgmr.msra.gmra.mxu3 %vm1158_vm10, %v2181_v0  ;;  %2185 = vmatmul.msk.f32.vlgmr.msrb.gmra.mxu0 %vm1158_vm10, %v2181_v0 }
 0x3a6   : > { %2187 = vmatmul.msk.f32.vlgmr.msrb.gmra.mxu1 %vm1158_vm10, %v2181_v0 }
 0x3e0   : > { %v1185_v5 = vpop.f32.mrf.mxu3 }
 0x3e1   : > { %v1225_v4 = vpop.f32.mrf.mxu1  ;;  %v1261_v25 = vadd.f32 %v1260_v7, %v1185_v5 }
 0x3e2   : > { %v1205_v3 = vpop.f32.mrf.mxu0 }
 0x3e8   : > { %v1280_v9 = vpop.f32.mrf.mxu3 }
 0x3e9   : > { %v1281_v18 = vadd.f32 %v1280_v9, %v1205_v3 }
 0x3ea   : > { %v1300_v6 = vpop.f32.mrf.mxu0  ;;  %v1345_v8 = vpop.f32.mrf.mxu1 }
 0x3eb   : > { %v1301_v20 = vadd.f32 %v1300_v6, %v1225_v4  ;;  %v1388_v29 = vadd.f32 %v1345_v8, %v1261_v25 }
 0x3f1   : > { %v1385_v13 = vpop.f32.mrf.mxu3 }
 0x3f2   : > { %v1365_v11 = vpop.f32.mrf.mxu2  ;;  %v1390_v26 = vadd.f32 %v1385_v13, %v1301_v20 }
 0x3f3   : > { %v1389_v23 = vadd.f32 %v1365_v11, %v1281_v18 }
 0x3fa   : > { %v1433_v10 = vpop.f32.mrf.mxu0  ;;  %v1453_v12 = vpop.f32.mrf.mxu1 }
 0x3fb   : > { %v1473_v15 = vpop.f32.mrf.mxu2  ;;  %v1477_v27 = vadd.f32 %v1453_v12, %v1389_v23  ;;  %v1476_v36 = vadd.f32 %v1433_v10, %v1388_v29 }
 0x3fc   : > { %v1478_v31 = vadd.f32 %v1473_v15, %v1390_v26 }
 0x402   : > { %v1541_v14 = vpop.f32.mrf.mxu0 }
 0x403   : > { %v1561_v17 = vpop.f32.mrf.mxu1  ;;  %v1565_v30 = vadd.f32 %v1541_v14, %v1477_v27 }
 0x404   : > { %v1566_v35 = vadd.f32 %v1561_v17, %v1478_v31 }
 0x408   : > { %v1521_v16 = vpop.f32.mrf.mxu3 }
 0x409   : > { %v1564_v40 = vadd.f32 %v1521_v16, %v1476_v36 }
 0x40b   : > { %v1649_v21 = vpop.f32.mrf.mxu0 }
 0x40c   : > { %v1654_v39 = vadd.f32 %v1649_v21, %v1566_v35 }
 0x410   : > { %v1609_v19 = vpop.f32.mrf.mxu2  ;;  %v1629_v24 = vpop.f32.mrf.mxu3 }
 0x411   : > { %v1653_v34 = vadd.f32 %v1629_v24, %v1565_v30  ;;  %v1652_v42 = vadd.f32 %v1609_v19, %v1564_v40 }
 0x412   : > { %v1697_v22 = vpop.f32.mrf.mxu1 }
 0x413   : > { %v1740_v49 = vadd.f32 %v1697_v22, %v1652_v42 }
 0x418   : > { %v1717_v28 = vpop.f32.mrf.mxu2 }
 0x419   : > { %v1741_v37 = vadd.f32 %v1717_v28, %v1653_v34  ;;  %v1737_v38 = vpop.f32.mrf.mxu3 }
 0x41a   : > { %v1785_v32 = vpop.f32.mrf.mxu0  ;;  %v1805_v33 = vpop.f32.mrf.mxu1  ;;  %v1742_v41 = vadd.f32 %v1737_v38, %v1654_v39 }
 0x41b   : > { %v1829_v43 = vadd.f32 %v1805_v33, %v1741_v37  ;;  %v1828_v53 = vadd.f32 %v1785_v32, %v1740_v49 }
 0x421   : > { %v1825_v44 = vpop.f32.mrf.mxu2 }
 0x422   : > { %v1830_v45 = vadd.f32 %v1825_v44, %v1742_v41  ;;  %v1893_v46 = vpop.f32.mrf.mxu0 }
 0x423   : > { %v1917_v47 = vadd.f32 %v1893_v46, %v1829_v43  ;;  %v1913_v48 = vpop.f32.mrf.mxu1 }
 0x424   : > { %v1918_v50 = vadd.f32 %v1913_v48, %v1830_v45 }
 0x425   : > { %v1925_v54 = vadd.f32 %v1922_v51, %v1917_v47 }
 0x426   : > { %v1926_v58 = vadd.f32 %v1922_v51, %v1918_v50 }
 0x427   : > { %v1928_v60 = vmul.f32 %v1925_v54, %v2445_v55 }
 0x428   : > { %v1873_v57 = vpop.f32.mrf.mxu3  ;;  %v1929_v63 = vmul.f32 %v1926_v58, %v2447_v56 }
 0x429   : > { %v1916_v59 = vadd.f32 %v1873_v57, %v1828_v53  ;;  %v1931_v1 = vsel %vm1068_vm9, %v1928_v60, 0.0 }
 0x42a   : > { %v1933_v3 = vsel %vm2630_vm1, %v1929_v63, 0.0 }
 0x42b   : > { %v1924_v61 = vadd.f32 %v1922_v51, %v1916_v59 }
 0x42d   : > { %v1927_v62 = vmul.f32 %v1924_v61, %v2443_v52 }
 0x42f   : > { %v1930_v0 = vsel %vm1068_vm9, %v1927_v62, 0.0 }
 0x430   : > { %v1932_v2 = vadd.f32 %v1931_v1, %v1930_v0 }
 0x432   : > { %v1934_v4 = vadd.f32 %v1933_v3, %v1932_v2 }
 0x434   : > { %1935 = vadd.xlane.f32.xlu1 %v1934_v4 }
 0x4a7   : > { %v1936_v5 = vpop.xlane.xlu1 %1935 }
 0x4a8   : > { %v1937_v6 = vmul.f32 0.00390625, %v1936_v5 }
 0x4aa   : > { %v1938_v7 = vsub.f32 %v1924_v61, %v1937_v6  ;;  %v1939_v8 = vsub.f32 %v1925_v54, %v1937_v6  ;;  %v1940_v9 = vsub.f32 %v1926_v58, %v1937_v6 }
 0x4ac   : > { %v1941_v10 = vmul.f32 %v1938_v7, %v2443_v52  ;;  %v1942_v11 = vmul.f32 %v1939_v8, %v2445_v55  ;;  %v1943_v12 = vmul.f32 %v1940_v9, %v2447_v56  ;;  %v1973_v56 = vpop.permute.xlu0 %1972 }
 0x4ae   : > { %v1944_v13 = vmul.f32 %v1941_v10, %v1941_v10  ;;  %v1945_v14 = vmul.f32 %v1942_v11, %v1942_v11  ;;  %v1946_v15 = vmul.f32 %v1943_v12, %v1943_v12 }
 0x4b0   : > { %v1947_v16 = vsel %vm1068_vm9, %v1944_v13, 0.0  ;;  %v1948_v17 = vsel %vm1068_vm9, %v1945_v14, 0.0  ;;  %v1950_v19 = vsel %vm2631_vm2, %v1946_v15, 0.0 }
 0x4b1   : > { %v1949_v18 = vadd.f32 %v1948_v17, %v1947_v16 }
 0x4b3   : > { %v1951_v20 = vadd.f32 %v1950_v19, %v1949_v18 }
 0x4b4   : > { %v1982_v35 = vpop.permute.xlu0 %1981 }
 0x4b5   : > { %1952 = vadd.xlane.f32.xlu2 %v1951_v20 }
 0x528   : > { %v1953_v21 = vpop.xlane.xlu2 %1952 }
 0x529   : > { %v1954_v22 = vmul.f32 0.00390625, %v1953_v21 }
 0x52b   : > { %v1955_v23 = vadd.f32 1e-05, %v1954_v22 }
 0x52d   : > { %2255 = vrsqrt.f32 %v1955_v23  ;;  %vm1962_vm4 = vweird.f32 %v1955_v23 }
 0x533   : > { %v2256_v52 = vpop.eup %2255 }
 0x534   : > { %v1957_v55 = vmul.f32 %v2256_v52, %v1955_v23  ;;  %vm1963_vm3 = vweird.f32 %v2256_v52 }
 0x535   : > { %vm1964_vm5 = vmor %vm1962_vm4, %vm1963_vm3 }
 0x536   : > { %v1958_v24 = vmul.f32 %v2256_v52, %v1957_v55 }
 0x538   : > { %v1959_v25 = vmul.f32 0.5, %v1958_v24 }
 0x53a   : > { %v1960_v26 = vsub.f32 1.5, %v1959_v25 }
 0x53c   : > { %v1961_v27 = vmul.f32 %v2256_v52, %v1960_v26 }
 0x53e   : > { %v1965_v28 = vsel %vm1964_vm5, %v2256_v52, %v1961_v27 }
 0x53f   : > { %v1966_v29 = vmul.f32 %v1965_v28, %v1941_v10  ;;  %v1967_v30 = vmul.f32 %v1965_v28, %v1942_v11  ;;  %v1968_v31 = vmul.f32 %v1965_v28, %v1943_v12 }
 0x541   : > { %v1975_v32 = vmul.f32 %v1973_v56, %v1966_v29  ;;  %v1976_v33 = vmul.f32 %v1973_v56, %v1967_v30  ;;  %v1977_v34 = vmul.f32 %v1973_v56, %v1968_v31 }
 0x543   : > { %v1984_v36 = vadd.f32 %v1982_v35, %v1975_v32  ;;  %v1985_v37 = vadd.f32 %v1982_v35, %v1976_v33  ;;  %v1986_v38 = vadd.f32 %v1982_v35, %v1977_v34 }
 0x545   : > { %vm1988_vm6 = vcmp.gt.f32.partialorder %v1985_v37, 0.0  ;;  %vm1989_vm7 = vcmp.gt.f32.partialorder %v1986_v38, 0.0  ;;  %v1990_v39 = vmul.f32 0.01, %v1984_v36  ;;  %v1991_v40 = vmul.f32 0.01, %v1985_v37 }
 0x546   : > { %v1992_v41 = vmul.f32 0.01, %v1986_v38  ;;  %vm1987_vm8 = vcmp.gt.f32.partialorder %v1984_v36, 0.0 }
 0x547   : > { %v1994_v42 = vsel %vm1988_vm6, %v1985_v37, %v1991_v40  ;;  %v1993_v45 = vsel %vm1987_vm8, %v1984_v36, %v1990_v39 }
 0x548   : > { %v1995_v43 = vsel %vm1989_vm7, %v1986_v38, %v1992_v41  ;;  %v1998_v44 = vrot.slane %v1994_v42, 4 }
 0x549   : > { %2002 = vst.msk [vmem:[%s339_s20 + $0x8] sm:$0xf] %vm2632_vm13, %v1995_v43 }
 0x54a   : > { %v1999_v46 = vsel %vm1068_vm9, %v1993_v45, %v1998_v44 }
 0x54b   : > { %2001 = vst [vmem:[%s339_s20] sm:$0xff] %v1999_v46 }
 0x54c PF: > { %s18_s27 = sadd.s32 1, %s2263_s27  }
 0x54d   : > { %p15_p4 = scmp.ge.s32.totalorder %s18_s27, 4  }
 0x54f   :  { %17 = sbr.rel (!%p15_p4) target bundleno = 1 (0x1), region = 113 }

</bundles_post_ra>
